<compile_context>
chip_gen: v7x
topology: tpu7x:2x2x1
jax: 0.10.0
libtpu: 0.0.40
codegen_flags: <defaults>
</compile_context>

<pallas_src>
import functools
import math

import jax
import jax.numpy as jnp
from jax.experimental import pallas as pl
from jax.experimental.pallas import tpu as pltpu


# ----------------------------- kernel -----------------------------------------

def _layernorm_f32(x, w, b, eps=1e-5):
    mu = jnp.mean(x, axis=-1, keepdims=True)
    var = jnp.mean(jnp.square(x - mu), axis=-1, keepdims=True)
    return (x - mu) * jax.lax.rsqrt(var + eps) * w + b


def encoder_stack_kernel(x0_ref,
                         ln1w_ref, ln1b_ref,
                         wqkv_ref, wp_ref, bp_ref,
                         ln2w_ref, ln2b_ref,
                         w1_ref, b1_ref, w2_ref, b2_ref,
                         xout_ref, wei_ref,
                         x_sc,
                         *, n_head, head_size):
    l = pl.program_id(1)                                    # layer index (sequential axis)

    @pl.when(l == 0)
    def _():
        x_sc[...] = x0_ref[...].astype(jnp.float32)         # load embedded input once per batch tile

    bt, T, C = x_sc.shape
    M = bt * T

    x = x_sc[...]                                           # (bt, T, C) f32, resident in VMEM
    xn = _layernorm_f32(x, ln1w_ref[0], ln1b_ref[0])        # norm1(src), f32

    # ---- fused Q/K/V: ONE (M, C) x (C, 3C) bf16 MXU matmul (weights pre-transposed host-side) ----
    xf = xn.reshape(M, C).astype(jnp.bfloat16)
    qkv = jnp.einsum('mc,cn->mn', xf, wqkv_ref[0],
                     preferred_element_type=jnp.float32)    # (M, 3C)
    q = qkv[:, 0:C] * (1.0 / math.sqrt(head_size))          # fold 1/sqrt(d) into q
    k = qkv[:, C:2 * C]                                     # 128-lane-aligned slices (free)
    v = qkv[:, 2 * C:3 * C]

    q = q.reshape(bt, T, C).astype(jnp.bfloat16)
    k = k.reshape(bt, T, C).astype(jnp.bfloat16)
    v = v.reshape(bt, T, C).astype(jnp.bfloat16)

    # ---- per-head attention (scores/softmax stay f32; exact reciprocal since wei is exported) ----
    # n_head is small (4); a static Python loop is fine here.  For larger n_head use
    # lax.fori_loop(..., unroll=True) to bound vreg live ranges.
    att_heads = []
    for h in range(n_head):
        lo = h * head_size
        hi = lo + head_size
        qh = q[:, :, lo:hi]                                 # (bt, T, d)
        kh = k[:, :, lo:hi]
        vh = v[:, :, lo:hi]
        s = jnp.einsum('btd,bsd->bts', qh, kh, preferred_element_type=jnp.float32)
        s = s - jnp.max(s, axis=-1, keepdims=True)          # numerically-stable softmax
        p = jnp.exp(s)
        wei = p * pl.reciprocal(jnp.sum(p, axis=-1, keepdims=True))   # exact (exported weights)
        # TODO(synk): at real T the (..., T, T) wei export dominates HBM writes and uses masked
        # lane stores; keep it only because the reference module returns the attention weights.
        wei_ref[0, h] = wei.astype(wei_ref.dtype)
        av = jnp.einsum('bts,bsd->btd', wei.astype(jnp.bfloat16), vh,
                        preferred_element_type=jnp.float32)
        att_heads.append(av.astype(jnp.bfloat16))

    # concat heads on the lane dim, then ONE (M, C) x (C, C) output projection (K = C, full MXU depth)
    att_cat = jnp.concatenate(att_heads, axis=-1).reshape(M, C)       # (M, C) bf16
    att = jnp.einsum('mc,co->mo', att_cat, wp_ref[0],
                     preferred_element_type=jnp.float32) + bp_ref[0]  # (M, C) f32
    att = att.reshape(bt, T, C)

    # ---- residual, norm2, FFN (flattened (M, C) bf16 MXU matmuls, f32 elementwise) ----
    # TODO(synk): dropout1/dropout2 have p=0.0 in the reference Encoder -> identity, not implemented.
    src = x + att
    src = _layernorm_f32(src, ln2w_ref[0], ln2b_ref[0])
    sf = src.reshape(M, C).astype(jnp.bfloat16)
    h1 = jnp.einsum('mc,ch->mh', sf, w1_ref[0],
                    preferred_element_type=jnp.float32) + b1_ref[0]
    h1 = jnp.maximum(h1, 0.0)
    h2 = jnp.einsum('mh,ho->mo', h1.astype(jnp.bfloat16), w2_ref[0],
                    preferred_element_type=jnp.float32) + b2_ref[0]
    new_x = src + h2.reshape(bt, T, C)                      # residual base = NORMALIZED tensor (matches spec)

    x_sc[...] = new_x                                       # carry activation to next layer in VMEM

    @pl.when(l == pl.num_programs(1) - 1)
    def _():
        xout_ref[...] = new_x.astype(xout_ref.dtype)


# ----------------------------- wrapper -----------------------------------------

def _num_tensorcores():
    """Best-effort query of TensorCores per chip; defaults to 1 (safe on v5e/v6e)."""
    try:
        info = pltpu.get_tpu_info()
        for attr in ("num_cores", "tensorcores_per_chip", "cores_per_chip", "core_count"):
            v = getattr(info, attr, None)
            if v:
                return int(v)
    except Exception:
        pass
    return 1


def encoder_forward(idx, params, *, n_head):
    emb = params['emb']                    # (vocab, C)
    pos = params['pos']                    # (block_size, C) learned positional embedding
    st = params['layers']                  # per-layer weights stacked along a leading n_layer axis
    B, T = idx.shape
    C = emb.shape[1]
    n_layer = st['wq'].shape[0]
    head_size = C // n_head
    bf16 = jnp.bfloat16

    # glue: embedding lookup + positional embedding add
    x = jnp.take(emb, idx, axis=0) + pos[None, :T, :]
    x = x.astype(jnp.float32)

    # host-side weight packing (one-time, outside the kernel):
    #  * fuse Q/K/V into one (L, C, 3C) tensor
    #  * pre-transpose every matrix so in-kernel contractions are plain (M,K)x(K,N)
    wqkv = jnp.concatenate([jnp.swapaxes(st['wq'], 1, 2),
                            jnp.swapaxes(st['wk'], 1, 2),
                            jnp.swapaxes(st['wv'], 1, 2)], axis=-1).astype(bf16)   # (L, C, 3C)
    wp_t = jnp.swapaxes(st['wp'], 1, 2).astype(bf16)                               # (L, C, C)
    w1_t = jnp.swapaxes(st['w1'], 1, 2).astype(bf16)                               # (L, C, 4C)
    w2_t = jnp.swapaxes(st['w2'], 1, 2).astype(bf16)                               # (L, 4C, C)

    # Batch tiling: only split B across tiles when the chip actually has >= 2 TensorCores
    # (v7x megacore).  On single-TC chips splitting just replays the per-layer weight DMA
    # stream and shrinks M (MXU row fill) for zero parallelism gain.
    ncores = _num_tensorcores()
    nbt = 2 if (ncores >= 2 and B >= 2 and B % 2 == 0) else 1
    bt = B // nbt

    kernel = functools.partial(encoder_stack_kernel, n_head=n_head, head_size=head_size)

    def wspec(r, c):
        return pl.BlockSpec((1, r, c), lambda b, l: (l, 0, 0))

    in_specs = [
        pl.BlockSpec((bt, T, C), lambda b, l: (b, 0, 0)),    # x (embedded input)
        wspec(1, C), wspec(1, C),                            # ln1 gamma/beta
        wspec(C, 3 * C),                                     # fused wqkv (pre-transposed)
        wspec(C, C), wspec(1, C),                            # wp (pre-transposed), bp
        wspec(1, C), wspec(1, C),                            # ln2 gamma/beta
        wspec(C, 4 * C), wspec(1, 4 * C),                    # fc1 (pre-transposed), b1
        wspec(4 * C, C), wspec(1, C),                        # fc2 (pre-transposed), b2
    ]
    out_specs = (
        pl.BlockSpec((bt, T, C), lambda b, l: (b, 0, 0)),
        pl.BlockSpec((1, n_head, bt, T, T), lambda b, l: (l, 0, b, 0, 0)),
    )
    out_shape = (
        jax.ShapeDtypeStruct((B, T, C), jnp.float32),
        jax.ShapeDtypeStruct((n_layer, n_head, B, T, T), jnp.float32),
    )

    grid_spec = pltpu.PrefetchScalarGridSpec(
        num_scalar_prefetch=0,
        grid=(nbt, n_layer),                                 # layers innermost (sequential)
        in_specs=in_specs,
        out_specs=out_specs,
        scratch_shapes=[pltpu.VMEM((bt, T, C), jnp.float32)],
    )

    x_out, wei = pl.pallas_call(
        kernel,
        grid_spec=grid_spec,
        out_shape=out_shape,
        compiler_params=pltpu.CompilerParams(
            dimension_semantics=("parallel", "arbitrary"),
            vmem_limit_bytes=32 * 1024 * 1024),              # explicit: safe on v5e/v6e/v7x
    )(x,
      st['ln1w'], st['ln1b'],
      wqkv, wp_t, st['bp'],
      st['ln2w'], st['ln2b'],
      w1_t, st['b1'], w2_t, st['b2'])
    return x_out, wei


# ----------------------------- parameters --------------------------------------

def make_params(key, *, n_layer, n_embd, n_head, vocab_size, block_size):
    C = n_embd
    k_emb, k_pos, k_lay = jax.random.split(key, 3)
    emb = jax.random.normal(k_emb, (vocab_size, C), jnp.float32)     # nn.Embedding default N(0,1)
    pos = jax.random.normal(k_pos, (block_size, C), jnp.float32)     # learned positional embedding

    def uni(k, shape, fan_in):
        b = 1.0 / math.sqrt(fan_in)
        return jax.random.uniform(k, shape, jnp.float32, -b, b)

    kq, kk, kv, kpw, kpb, k1w, k1b, k2w, k2b = jax.random.split(k_lay, 9)
    layers = dict(
        ln1w=jnp.ones((n_layer, 1, C), jnp.float32),
        ln1b=jnp.zeros((n_layer, 1, C), jnp.float32),
        ln2w=jnp.ones((n_layer, 1, C), jnp.float32),
        ln2b=jnp.zeros((n_layer, 1, C), jnp.float32),
        # per-head query/key/value Linears (bias=False) stacked row-wise -> (C, C), PyTorch (out, in)
        wq=uni(kq, (n_layer, C, C), C),
        wk=uni(kk, (n_layer, C, C), C),
        wv=uni(kv, (n_layer, C, C), C),
        wp=uni(kpw, (n_layer, C, C), C),
        bp=uni(kpb, (n_layer, 1, C), C),
        w1=uni(k1w, (n_layer, 4 * C, C), C),
        b1=uni(k1b, (n_layer, 1, 4 * C), C),
        w2=uni(k2w, (n_layer, C, 4 * C), 4 * C),
        b2=uni(k2b, (n_layer, 1, C), 4 * C),
    )
    return dict(emb=emb, pos=pos, layers=layers)


# ----------------------------- pure-JAX reference (f32) ------------------------

def encoder_reference(idx, params, *, n_head):
    emb, pos, st = params['emb'], params['pos'], params['layers']
    B, T = idx.shape
    C = emb.shape[1]
    hs = C // n_head
    n_layer = st['wq'].shape[0]
    x = jnp.take(emb, idx, axis=0) + pos[None, :T, :]
    all_wei = []
    for l in range(n_layer):
        xn = _layernorm_f32(x, st['ln1w'][l], st['ln1b'][l])
        q = xn @ st['wq'][l].T
        k = xn @ st['wk'][l].T
        v = xn @ st['wv'][l].T
        heads, weis = [], []
        for h in range(n_head):
            sl = slice(h * hs, (h + 1) * hs)
            s = jnp.einsum('btd,bsd->bts', q[..., sl], k[..., sl]) / math.sqrt(hs)
            w = jax.nn.softmax(s, axis=-1)
            weis.append(w)
            heads.append(jnp.einsum('bts,bsd->btd', w, v[..., sl]))
        att = jnp.concatenate(heads, axis=-1) @ st['wp'][l].T + st['bp'][l]
        src = x + att
        src = _layernorm_f32(src, st['ln2w'][l], st['ln2b'][l])
        h1 = jax.nn.relu(src @ st['w1'][l].T + st['b1'][l])
        h2 = h1 @ st['w2'][l].T + st['b2'][l]
        x = src + h2
        all_wei.append(jnp.stack(weis, axis=0))
    return x, jnp.stack(all_wei, axis=0)


# ----------------------------- main ---------------------------------------------

if __name__ == "__main__":
    # small but lane-dense shapes (C = 128 -> dense vreg lanes; 4C = 512, 3C = 384)
    n_layer, n_embd, n_head = 2, 128, 4
    vocab_size, block_size = 64, 16
    B, T = 2, 8

    key = jax.random.PRNGKey(0)
    k_params, k_idx = jax.random.split(key)
    params = make_params(k_params, n_layer=n_layer, n_embd=n_embd, n_head=n_head,
                         vocab_size=vocab_size, block_size=block_size)
    idx = jax.random.randint(k_idx, (B, T), 0, vocab_size, dtype=jnp.int32)

    x_out, wei = encoder_forward(idx, params, n_head=n_head)
    x_out, wei = jax.block_until_ready((x_out, wei))

    assert x_out.shape == (B, T, n_embd), x_out.shape
    assert wei.shape == (n_layer, n_head, B, T, T), wei.shape
    assert bool(jnp.all(jnp.isfinite(x_out)))
    # attention rows must sum to ~1 (exact softmax divide in the kernel)
    assert bool(jnp.all(jnp.abs(jnp.sum(wei, axis=-1) - 1.0) < 1e-3))
    # loose check vs f32 reference (kernel uses bf16 MXU operands)
    x_ref, wei_ref = encoder_reference(idx, params, n_head=n_head)
    assert bool(jnp.max(jnp.abs(x_out - x_ref)) < 0.2), float(jnp.max(jnp.abs(x_out - x_ref)))
    assert bool(jnp.max(jnp.abs(wei - wei_ref)) < 2e-2), float(jnp.max(jnp.abs(wei - wei_ref)))

    print("KERNEL_OK")
</pallas_src>

<mosaic_0001>
module attributes {stable_mosaic.version = 11 : i64} {
  func.func @encoder_stack_kernel(%arg0: i32, %arg1: i32, %arg2: memref<2x8x128xf32, #tpu.memory_space<vmem>>, %arg3: memref<1x1x128xf32, #tpu.memory_space<vmem>>, %arg4: memref<1x1x128xf32, #tpu.memory_space<vmem>>, %arg5: memref<1x128x384xbf16, #tpu.memory_space<vmem>>, %arg6: memref<1x128x128xbf16, #tpu.memory_space<vmem>>, %arg7: memref<1x1x128xf32, #tpu.memory_space<vmem>>, %arg8: memref<1x1x128xf32, #tpu.memory_space<vmem>>, %arg9: memref<1x1x128xf32, #tpu.memory_space<vmem>>, %arg10: memref<1x128x512xbf16, #tpu.memory_space<vmem>>, %arg11: memref<1x1x512xf32, #tpu.memory_space<vmem>>, %arg12: memref<1x512x128xbf16, #tpu.memory_space<vmem>>, %arg13: memref<1x1x128xf32, #tpu.memory_space<vmem>>, %arg14: memref<2x8x128xf32, #tpu.memory_space<vmem>>, %arg15: memref<1x4x2x8x8xf32, #tpu.memory_space<vmem>>, %arg16: memref<2x8x128xf32, #tpu.memory_space<vmem>>) attributes {dimension_semantics = [#tpu.dimension_semantics<parallel>, #tpu.dimension_semantics<arbitrary>], iteration_bounds = array<i64: 1, 2>, scalar_prefetch = 0 : i64, scratch_operands = 1 : i64, tpu.core_type = #tpu.core_type<tc>, window_params = [{transform_indices = @transform_0, window_bounds = array<i64: 2, 8, 128>}, {transform_indices = @transform_1, window_bounds = array<i64: 1, 1, 128>}, {transform_indices = @transform_2, window_bounds = array<i64: 1, 1, 128>}, {transform_indices = @transform_3, window_bounds = array<i64: 1, 128, 384>}, {transform_indices = @transform_4, window_bounds = array<i64: 1, 128, 128>}, {transform_indices = @transform_5, window_bounds = array<i64: 1, 1, 128>}, {transform_indices = @transform_6, window_bounds = array<i64: 1, 1, 128>}, {transform_indices = @transform_7, window_bounds = array<i64: 1, 1, 128>}, {transform_indices = @transform_8, window_bounds = array<i64: 1, 128, 512>}, {transform_indices = @transform_9, window_bounds = array<i64: 1, 1, 512>}, {transform_indices = @transform_10, window_bounds = array<i64: 1, 512, 128>}, {transform_indices = @transform_11, window_bounds = array<i64: 1, 1, 128>}, {transform_indices = @transform_12, window_bounds = array<i64: 2, 8, 128>}, {transform_indices = @transform_13, window_bounds = array<i64: 1, 4, 2, 8, 8>}]} {
    %c0_i32 = arith.constant 0 : i32
    %0 = arith.cmpi eq, %arg1, %c0_i32 : i32
    %1 = arith.extui %0 : i1 to i32
    %c0_i32_0 = arith.constant 0 : i32
    %2 = arith.cmpi ne, %1, %c0_i32_0 : i32
    scf.if %2 {
      %c0_88 = arith.constant 0 : index
      %c0_89 = arith.constant 0 : index
      %c0_90 = arith.constant 0 : index
      %192 = vector.load %arg2[%c0_88, %c0_89, %c0_90] : memref<2x8x128xf32, #tpu.memory_space<vmem>>, vector<2x8x128xf32>
      %c0_91 = arith.constant 0 : index
      %c0_92 = arith.constant 0 : index
      %c0_93 = arith.constant 0 : index
      %193 = vector.load %arg16[%c0_91, %c0_92, %c0_93] : memref<2x8x128xf32, #tpu.memory_space<vmem>>, vector<2x8x128xf32>
      tpu.vector_store %arg16[%c0_91, %c0_92, %c0_93], %192 {strides = array<i32>} : memref<2x8x128xf32, #tpu.memory_space<vmem>>, vector<2x8x128xf32>,
    } else {
    }
    %c0 = arith.constant 0 : index
    %c0_1 = arith.constant 0 : index
    %c0_2 = arith.constant 0 : index
    %3 = vector.load %arg16[%c0, %c0_1, %c0_2] : memref<2x8x128xf32, #tpu.memory_space<vmem>>, vector<2x8x128xf32>
    %c0_3 = arith.constant 0 : index
    %c0_4 = arith.constant 0 : index
    %c0_5 = arith.constant 0 : index
    %4 = vector.load %arg3[%c0_3, %c0_4, %c0_5] : memref<1x1x128xf32, #tpu.memory_space<vmem>>, vector<1x1x128xf32>
    %5 = vector.shape_cast %4 : vector<1x1x128xf32> to vector<1x128xf32>
    %c0_6 = arith.constant 0 : index
    %c0_7 = arith.constant 0 : index
    %c0_8 = arith.constant 0 : index
    %6 = vector.load %arg4[%c0_6, %c0_7, %c0_8] : memref<1x1x128xf32, #tpu.memory_space<vmem>>, vector<1x1x128xf32>
    %7 = vector.shape_cast %6 : vector<1x1x128xf32> to vector<1x128xf32>
    %cst = arith.constant dense<0.000000e+00> : vector<2x8xf32>
    %8 = vector.multi_reduction <add>, %3, %cst [2] : vector<2x8x128xf32> to vector<2x8xf32>
    %9 = vector.shape_cast %8 : vector<2x8xf32> to vector<2x8x1xf32>
    %cst_9 = arith.constant 1.280000e+02 : f32
    %10 = vector.broadcast %cst_9 : f32 to vector<2x8x1xf32>
    %11 = arith.divf %9, %10 : vector<2x8x1xf32>
    %12 = vector.broadcast %11 : vector<2x8x1xf32> to vector<2x8x128xf32>
    %13 = arith.subf %3, %12 : vector<2x8x128xf32>
    %14 = arith.mulf %13, %13 : vector<2x8x128xf32>
    %cst_10 = arith.constant dense<0.000000e+00> : vector<2x8xf32>
    %15 = vector.multi_reduction <add>, %14, %cst_10 [2] : vector<2x8x128xf32> to vector<2x8xf32>
    %16 = vector.shape_cast %15 : vector<2x8xf32> to vector<2x8x1xf32>
    %cst_11 = arith.constant 1.280000e+02 : f32
    %17 = vector.broadcast %cst_11 : f32 to vector<2x8x1xf32>
    %18 = arith.divf %16, %17 : vector<2x8x1xf32>
    %19 = vector.broadcast %11 : vector<2x8x1xf32> to vector<2x8x128xf32>
    %20 = arith.subf %3, %19 : vector<2x8x128xf32>
    %cst_12 = arith.constant 9.99999974E-6 : f32
    %21 = vector.broadcast %cst_12 : f32 to vector<2x8x1xf32>
    %22 = arith.addf %18, %21 : vector<2x8x1xf32>
    %23 = math.rsqrt %22 : vector<2x8x1xf32>
    %24 = vector.broadcast %23 : vector<2x8x1xf32> to vector<2x8x128xf32>
    %25 = arith.mulf %20, %24 : vector<2x8x128xf32>
    %26 = vector.shape_cast %5 : vector<1x128xf32> to vector<1x1x128xf32>
    %27 = vector.broadcast %26 : vector<1x1x128xf32> to vector<2x8x128xf32>
    %28 = arith.mulf %25, %27 : vector<2x8x128xf32>
    %29 = vector.shape_cast %7 : vector<1x128xf32> to vector<1x1x128xf32>
    %30 = vector.broadcast %29 : vector<1x1x128xf32> to vector<2x8x128xf32>
    %31 = arith.addf %28, %30 : vector<2x8x128xf32>
    %32 = vector.shape_cast %31 : vector<2x8x128xf32> to vector<16x128xf32>
    %33 = arith.truncf %32 : vector<16x128xf32> to vector<16x128xbf16>
    %c0_13 = arith.constant 0 : index
    %c0_14 = arith.constant 0 : index
    %c0_15 = arith.constant 0 : index
    %34 = vector.load %arg5[%c0_13, %c0_14, %c0_15] : memref<1x128x384xbf16, #tpu.memory_space<vmem>>, vector<1x128x384xbf16>
    %35 = vector.shape_cast %34 : vector<1x128x384xbf16> to vector<128x384xbf16>
    "tpu.trace_start"() <{level = 10 : i32, message = "mc,cn->mn"}> : () -> ()
    %cst_16 = arith.constant dense<0.000000e+00> : vector<16x384xf32>
    %36 = tpu.matmul %33, %35, %cst_16 {dimension_numbers = #tpu.dot_dimension_numbers<[1], [0], [0], [1], [0, 0, 1, 1], [], []>} : vector<16x128xbf16>, vector<128x384xbf16>, vector<16x384xf32> -> vector<16x384xf32>
    "tpu.trace_stop"() : () -> ()
    %37 = vector.extract_strided_slice %36 {offsets = [0, 0], sizes = [16, 128], strides = [1, 1]} : vector<16x384xf32> to vector<16x128xf32>
    %cst_17 = arith.constant 0.176776692 : f32
    %38 = vector.broadcast %cst_17 : f32 to vector<16x128xf32>
    %39 = arith.mulf %37, %38 : vector<16x128xf32>
    %40 = vector.extract_strided_slice %36 {offsets = [0, 128], sizes = [16, 128], strides = [1, 1]} : vector<16x384xf32> to vector<16x128xf32>
    %41 = vector.extract_strided_slice %36 {offsets = [0, 256], sizes = [16, 128], strides = [1, 1]} : vector<16x384xf32> to vector<16x128xf32>
    %42 = vector.shape_cast %39 : vector<16x128xf32> to vector<2x8x128xf32>
    %43 = arith.truncf %42 : vector<2x8x128xf32> to vector<2x8x128xbf16>
    %44 = vector.shape_cast %40 : vector<16x128xf32> to vector<2x8x128xf32>
    %45 = arith.truncf %44 : vector<2x8x128xf32> to vector<2x8x128xbf16>
    %46 = vector.shape_cast %41 : vector<16x128xf32> to vector<2x8x128xf32>
    %47 = arith.truncf %46 : vector<2x8x128xf32> to vector<2x8x128xbf16>
    %48 = vector.extract_strided_slice %43 {offsets = [0, 0, 0], sizes = [2, 8, 32], strides = [1, 1, 1]} : vector<2x8x128xbf16> to vector<2x8x32xbf16>
    %49 = vector.extract_strided_slice %45 {offsets = [0, 0, 0], sizes = [2, 8, 32], strides = [1, 1, 1]} : vector<2x8x128xbf16> to vector<2x8x32xbf16>
    %50 = vector.extract_strided_slice %47 {offsets = [0, 0, 0], sizes = [2, 8, 32], strides = [1, 1, 1]} : vector<2x8x128xbf16> to vector<2x8x32xbf16>
    "tpu.trace_start"() <{level = 10 : i32, message = "btd,bsd->bts"}> : () -> ()
    %cst_18 = arith.constant dense<0.000000e+00> : vector<2x8x8xf32>
    %51 = tpu.matmul %48, %49, %cst_18 {dimension_numbers = #tpu.dot_dimension_numbers<[2], [2], [1], [1], [0, 0, 0, 1, 1, 1], [0], [0]>} : vector<2x8x32xbf16>, vector<2x8x32xbf16>, vector<2x8x8xf32> -> vector<2x8x8xf32>
    "tpu.trace_stop"() : () -> ()
    %cst_19 = arith.constant dense<0xFF800000> : vector<2x8xf32>
    %52 = vector.multi_reduction <maximumf>, %51, %cst_19 [2] : vector<2x8x8xf32> to vector<2x8xf32>
    %53 = vector.shape_cast %52 : vector<2x8xf32> to vector<2x8x1xf32>
    %54 = vector.broadcast %53 : vector<2x8x1xf32> to vector<2x8x8xf32>
    %55 = arith.subf %51, %54 : vector<2x8x8xf32>
    %56 = math.exp %55 : vector<2x8x8xf32>
    %cst_20 = arith.constant dense<0.000000e+00> : vector<2x8xf32>
    %57 = vector.multi_reduction <add>, %56, %cst_20 [2] : vector<2x8x8xf32> to vector<2x8xf32>
    %58 = vector.shape_cast %57 : vector<2x8xf32> to vector<2x8x1xf32>
    %59 = tpu.reciprocal %58 : vector<2x8x1xf32> -> vector<2x8x1xf32>
    %60 = vector.broadcast %59 : vector<2x8x1xf32> to vector<2x8x8xf32>
    %61 = arith.mulf %56, %60 : vector<2x8x8xf32>
    %c0_21 = arith.constant 0 : index
    %c0_22 = arith.constant 0 : index
    %c0_23 = arith.constant 0 : index
    %c0_24 = arith.constant 0 : index
    %c0_25 = arith.constant 0 : index
    %62 = vector.load %arg15[%c0_21, %c0_22, %c0_23, %c0_24, %c0_25] : memref<1x4x2x8x8xf32, #tpu.memory_space<vmem>>, vector<1x1x2x8x8xf32>
    %63 = vector.shape_cast %62 : vector<1x1x2x8x8xf32> to vector<2x8x8xf32>
    %64 = vector.shape_cast %61 : vector<2x8x8xf32> to vector<1x1x2x8x8xf32>
    tpu.vector_store %arg15[%c0_21, %c0_22, %c0_23, %c0_24, %c0_25], %64 {strides = array<i32>} : memref<1x4x2x8x8xf32, #tpu.memory_space<vmem>>, vector<1x1x2x8x8xf32>,
    %65 = arith.truncf %61 : vector<2x8x8xf32> to vector<2x8x8xbf16>
    "tpu.trace_start"() <{level = 10 : i32, message = "bts,bsd->btd"}> : () -> ()
    %cst_26 = arith.constant dense<0.000000e+00> : vector<2x8x32xf32>
    %66 = tpu.matmul %65, %50, %cst_26 {dimension_numbers = #tpu.dot_dimension_numbers<[2], [1], [1], [2], [0, 0, 0, 1, 1, 2], [0], [0]>} : vector<2x8x8xbf16>, vector<2x8x32xbf16>, vector<2x8x32xf32> -> vector<2x8x32xf32>
    "tpu.trace_stop"() : () -> ()
    %67 = arith.truncf %66 : vector<2x8x32xf32> to vector<2x8x32xbf16>
    %68 = vector.extract_strided_slice %43 {offsets = [0, 0, 32], sizes = [2, 8, 32], strides = [1, 1, 1]} : vector<2x8x128xbf16> to vector<2x8x32xbf16>
    %69 = vector.extract_strided_slice %45 {offsets = [0, 0, 32], sizes = [2, 8, 32], strides = [1, 1, 1]} : vector<2x8x128xbf16> to vector<2x8x32xbf16>
    %70 = vector.extract_strided_slice %47 {offsets = [0, 0, 32], sizes = [2, 8, 32], strides = [1, 1, 1]} : vector<2x8x128xbf16> to vector<2x8x32xbf16>
    "tpu.trace_start"() <{level = 10 : i32, message = "btd,bsd->bts"}> : () -> ()
    %cst_27 = arith.constant dense<0.000000e+00> : vector<2x8x8xf32>
    %71 = tpu.matmul %68, %69, %cst_27 {dimension_numbers = #tpu.dot_dimension_numbers<[2], [2], [1], [1], [0, 0, 0, 1, 1, 1], [0], [0]>} : vector<2x8x32xbf16>, vector<2x8x32xbf16>, vector<2x8x8xf32> -> vector<2x8x8xf32>
    "tpu.trace_stop"() : () -> ()
    %cst_28 = arith.constant dense<0xFF800000> : vector<2x8xf32>
    %72 = vector.multi_reduction <maximumf>, %71, %cst_28 [2] : vector<2x8x8xf32> to vector<2x8xf32>
    %73 = vector.shape_cast %72 : vector<2x8xf32> to vector<2x8x1xf32>
    %74 = vector.broadcast %73 : vector<2x8x1xf32> to vector<2x8x8xf32>
    %75 = arith.subf %71, %74 : vector<2x8x8xf32>
    %76 = math.exp %75 : vector<2x8x8xf32>
    %cst_29 = arith.constant dense<0.000000e+00> : vector<2x8xf32>
    %77 = vector.multi_reduction <add>, %76, %cst_29 [2] : vector<2x8x8xf32> to vector<2x8xf32>
    %78 = vector.shape_cast %77 : vector<2x8xf32> to vector<2x8x1xf32>
    %79 = tpu.reciprocal %78 : vector<2x8x1xf32> -> vector<2x8x1xf32>
    %80 = vector.broadcast %79 : vector<2x8x1xf32> to vector<2x8x8xf32>
    %81 = arith.mulf %76, %80 : vector<2x8x8xf32>
    %c0_30 = arith.constant 0 : index
    %c1 = arith.constant 1 : index
    %c0_31 = arith.constant 0 : index
    %c0_32 = arith.constant 0 : index
    %c0_33 = arith.constant 0 : index
    %82 = vector.load %arg15[%c0_30, %c1, %c0_31, %c0_32, %c0_33] : memref<1x4x2x8x8xf32, #tpu.memory_space<vmem>>, vector<1x1x2x8x8xf32>
    %83 = vector.shape_cast %82 : vector<1x1x2x8x8xf32> to vector<2x8x8xf32>
    %84 = vector.shape_cast %81 : vector<2x8x8xf32> to vector<1x1x2x8x8xf32>
    tpu.vector_store %arg15[%c0_30, %c1, %c0_31, %c0_32, %c0_33], %84 {strides = array<i32>} : memref<1x4x2x8x8xf32, #tpu.memory_space<vmem>>, vector<1x1x2x8x8xf32>,
    %85 = arith.truncf %81 : vector<2x8x8xf32> to vector<2x8x8xbf16>
    "tpu.trace_start"() <{level = 10 : i32, message = "bts,bsd->btd"}> : () -> ()
    %cst_34 = arith.constant dense<0.000000e+00> : vector<2x8x32xf32>
    %86 = tpu.matmul %85, %70, %cst_34 {dimension_numbers = #tpu.dot_dimension_numbers<[2], [1], [1], [2], [0, 0, 0, 1, 1, 2], [0], [0]>} : vector<2x8x8xbf16>, vector<2x8x32xbf16>, vector<2x8x32xf32> -> vector<2x8x32xf32>
    "tpu.trace_stop"() : () -> ()
    %87 = arith.truncf %86 : vector<2x8x32xf32> to vector<2x8x32xbf16>
    %88 = vector.extract_strided_slice %43 {offsets = [0, 0, 64], sizes = [2, 8, 32], strides = [1, 1, 1]} : vector<2x8x128xbf16> to vector<2x8x32xbf16>
    %89 = vector.extract_strided_slice %45 {offsets = [0, 0, 64], sizes = [2, 8, 32], strides = [1, 1, 1]} : vector<2x8x128xbf16> to vector<2x8x32xbf16>
    %90 = vector.extract_strided_slice %47 {offsets = [0, 0, 64], sizes = [2, 8, 32], strides = [1, 1, 1]} : vector<2x8x128xbf16> to vector<2x8x32xbf16>
    "tpu.trace_start"() <{level = 10 : i32, message = "btd,bsd->bts"}> : () -> ()
    %cst_35 = arith.constant dense<0.000000e+00> : vector<2x8x8xf32>
    %91 = tpu.matmul %88, %89, %cst_35 {dimension_numbers = #tpu.dot_dimension_numbers<[2], [2], [1], [1], [0, 0, 0, 1, 1, 1], [0], [0]>} : vector<2x8x32xbf16>, vector<2x8x32xbf16>, vector<2x8x8xf32> -> vector<2x8x8xf32>
    "tpu.trace_stop"() : () -> ()
    %cst_36 = arith.constant dense<0xFF800000> : vector<2x8xf32>
    %92 = vector.multi_reduction <maximumf>, %91, %cst_36 [2] : vector<2x8x8xf32> to vector<2x8xf32>
    %93 = vector.shape_cast %92 : vector<2x8xf32> to vector<2x8x1xf32>
    %94 = vector.broadcast %93 : vector<2x8x1xf32> to vector<2x8x8xf32>
    %95 = arith.subf %91, %94 : vector<2x8x8xf32>
    %96 = math.exp %95 : vector<2x8x8xf32>
    %cst_37 = arith.constant dense<0.000000e+00> : vector<2x8xf32>
    %97 = vector.multi_reduction <add>, %96, %cst_37 [2] : vector<2x8x8xf32> to vector<2x8xf32>
    %98 = vector.shape_cast %97 : vector<2x8xf32> to vector<2x8x1xf32>
    %99 = tpu.reciprocal %98 : vector<2x8x1xf32> -> vector<2x8x1xf32>
    %100 = vector.broadcast %99 : vector<2x8x1xf32> to vector<2x8x8xf32>
    %101 = arith.mulf %96, %100 : vector<2x8x8xf32>
    %c0_38 = arith.constant 0 : index
    %c2 = arith.constant 2 : index
    %c0_39 = arith.constant 0 : index
    %c0_40 = arith.constant 0 : index
    %c0_41 = arith.constant 0 : index
    %102 = vector.load %arg15[%c0_38, %c2, %c0_39, %c0_40, %c0_41] : memref<1x4x2x8x8xf32, #tpu.memory_space<vmem>>, vector<1x1x2x8x8xf32>
    %103 = vector.shape_cast %102 : vector<1x1x2x8x8xf32> to vector<2x8x8xf32>
    %104 = vector.shape_cast %101 : vector<2x8x8xf32> to vector<1x1x2x8x8xf32>
    tpu.vector_store %arg15[%c0_38, %c2, %c0_39, %c0_40, %c0_41], %104 {strides = array<i32>} : memref<1x4x2x8x8xf32, #tpu.memory_space<vmem>>, vector<1x1x2x8x8xf32>,
    %105 = arith.truncf %101 : vector<2x8x8xf32> to vector<2x8x8xbf16>
    "tpu.trace_start"() <{level = 10 : i32, message = "bts,bsd->btd"}> : () -> ()
    %cst_42 = arith.constant dense<0.000000e+00> : vector<2x8x32xf32>
    %106 = tpu.matmul %105, %90, %cst_42 {dimension_numbers = #tpu.dot_dimension_numbers<[2], [1], [1], [2], [0, 0, 0, 1, 1, 2], [0], [0]>} : vector<2x8x8xbf16>, vector<2x8x32xbf16>, vector<2x8x32xf32> -> vector<2x8x32xf32>
    "tpu.trace_stop"() : () -> ()
    %107 = arith.truncf %106 : vector<2x8x32xf32> to vector<2x8x32xbf16>
    %108 = vector.extract_strided_slice %43 {offsets = [0, 0, 96], sizes = [2, 8, 32], strides = [1, 1, 1]} : vector<2x8x128xbf16> to vector<2x8x32xbf16>
    %109 = vector.extract_strided_slice %45 {offsets = [0, 0, 96], sizes = [2, 8, 32], strides = [1, 1, 1]} : vector<2x8x128xbf16> to vector<2x8x32xbf16>
    %110 = vector.extract_strided_slice %47 {offsets = [0, 0, 96], sizes = [2, 8, 32], strides = [1, 1, 1]} : vector<2x8x128xbf16> to vector<2x8x32xbf16>
    "tpu.trace_start"() <{level = 10 : i32, message = "btd,bsd->bts"}> : () -> ()
    %cst_43 = arith.constant dense<0.000000e+00> : vector<2x8x8xf32>
    %111 = tpu.matmul %108, %109, %cst_43 {dimension_numbers = #tpu.dot_dimension_numbers<[2], [2], [1], [1], [0, 0, 0, 1, 1, 1], [0], [0]>} : vector<2x8x32xbf16>, vector<2x8x32xbf16>, vector<2x8x8xf32> -> vector<2x8x8xf32>
    "tpu.trace_stop"() : () -> ()
    %cst_44 = arith.constant dense<0xFF800000> : vector<2x8xf32>
    %112 = vector.multi_reduction <maximumf>, %111, %cst_44 [2] : vector<2x8x8xf32> to vector<2x8xf32>
    %113 = vector.shape_cast %112 : vector<2x8xf32> to vector<2x8x1xf32>
    %114 = vector.broadcast %113 : vector<2x8x1xf32> to vector<2x8x8xf32>
    %115 = arith.subf %111, %114 : vector<2x8x8xf32>
    %116 = math.exp %115 : vector<2x8x8xf32>
    %cst_45 = arith.constant dense<0.000000e+00> : vector<2x8xf32>
    %117 = vector.multi_reduction <add>, %116, %cst_45 [2] : vector<2x8x8xf32> to vector<2x8xf32>
    %118 = vector.shape_cast %117 : vector<2x8xf32> to vector<2x8x1xf32>
    %119 = tpu.reciprocal %118 : vector<2x8x1xf32> -> vector<2x8x1xf32>
    %120 = vector.broadcast %119 : vector<2x8x1xf32> to vector<2x8x8xf32>
    %121 = arith.mulf %116, %120 : vector<2x8x8xf32>
    %c0_46 = arith.constant 0 : index
    %c3 = arith.constant 3 : index
    %c0_47 = arith.constant 0 : index
    %c0_48 = arith.constant 0 : index
    %c0_49 = arith.constant 0 : index
    %122 = vector.load %arg15[%c0_46, %c3, %c0_47, %c0_48, %c0_49] : memref<1x4x2x8x8xf32, #tpu.memory_space<vmem>>, vector<1x1x2x8x8xf32>
    %123 = vector.shape_cast %122 : vector<1x1x2x8x8xf32> to vector<2x8x8xf32>
    %124 = vector.shape_cast %121 : vector<2x8x8xf32> to vector<1x1x2x8x8xf32>
    tpu.vector_store %arg15[%c0_46, %c3, %c0_47, %c0_48, %c0_49], %124 {strides = array<i32>} : memref<1x4x2x8x8xf32, #tpu.memory_space<vmem>>, vector<1x1x2x8x8xf32>,
    %125 = arith.truncf %121 : vector<2x8x8xf32> to vector<2x8x8xbf16>
    "tpu.trace_start"() <{level = 10 : i32, message = "bts,bsd->btd"}> : () -> ()
    %cst_50 = arith.constant dense<0.000000e+00> : vector<2x8x32xf32>
    %126 = tpu.matmul %125, %110, %cst_50 {dimension_numbers = #tpu.dot_dimension_numbers<[2], [1], [1], [2], [0, 0, 0, 1, 1, 2], [0], [0]>} : vector<2x8x8xbf16>, vector<2x8x32xbf16>, vector<2x8x32xf32> -> vector<2x8x32xf32>
    "tpu.trace_stop"() : () -> ()
    %127 = arith.truncf %126 : vector<2x8x32xf32> to vector<2x8x32xbf16>
    %128 = tpu.concatenate %67, %87, %107, %127 in 2 : vector<2x8x32xbf16>, vector<2x8x32xbf16>, vector<2x8x32xbf16>, vector<2x8x32xbf16> -> vector<2x8x128xbf16>
    %129 = vector.shape_cast %128 : vector<2x8x128xbf16> to vector<16x128xbf16>
    %c0_51 = arith.constant 0 : index
    %c0_52 = arith.constant 0 : index
    %c0_53 = arith.constant 0 : index
    %130 = vector.load %arg6[%c0_51, %c0_52, %c0_53] : memref<1x128x128xbf16, #tpu.memory_space<vmem>>, vector<1x128x128xbf16>
    %131 = vector.shape_cast %130 : vector<1x128x128xbf16> to vector<128x128xbf16>
    "tpu.trace_start"() <{level = 10 : i32, message = "mc,co->mo"}> : () -> ()
    %cst_54 = arith.constant dense<0.000000e+00> : vector<16x128xf32>
    %132 = tpu.matmul %129, %131, %cst_54 {dimension_numbers = #tpu.dot_dimension_numbers<[1], [0], [0], [1], [0, 0, 1, 1], [], []>} : vector<16x128xbf16>, vector<128x128xbf16>, vector<16x128xf32> -> vector<16x128xf32>
    "tpu.trace_stop"() : () -> ()
    %c0_55 = arith.constant 0 : index
    %c0_56 = arith.constant 0 : index
    %c0_57 = arith.constant 0 : index
    %133 = vector.load %arg7[%c0_55, %c0_56, %c0_57] : memref<1x1x128xf32, #tpu.memory_space<vmem>>, vector<1x1x128xf32>
    %134 = vector.shape_cast %133 : vector<1x1x128xf32> to vector<1x128xf32>
    %135 = vector.broadcast %134 : vector<1x128xf32> to vector<16x128xf32>
    %136 = arith.addf %132, %135 : vector<16x128xf32>
    %137 = vector.shape_cast %136 : vector<16x128xf32> to vector<2x8x128xf32>
    %138 = arith.addf %3, %137 : vector<2x8x128xf32>
    %c0_58 = arith.constant 0 : index
    %c0_59 = arith.constant 0 : index
    %c0_60 = arith.constant 0 : index
    %139 = vector.load %arg8[%c0_58, %c0_59, %c0_60] : memref<1x1x128xf32, #tpu.memory_space<vmem>>, vector<1x1x128xf32>
    %140 = vector.shape_cast %139 : vector<1x1x128xf32> to vector<1x128xf32>
    %c0_61 = arith.constant 0 : index
    %c0_62 = arith.constant 0 : index
    %c0_63 = arith.constant 0 : index
    %141 = vector.load %arg9[%c0_61, %c0_62, %c0_63] : memref<1x1x128xf32, #tpu.memory_space<vmem>>, vector<1x1x128xf32>
    %142 = vector.shape_cast %141 : vector<1x1x128xf32> to vector<1x128xf32>
    %cst_64 = arith.constant dense<0.000000e+00> : vector<2x8xf32>
    %143 = vector.multi_reduction <add>, %138, %cst_64 [2] : vector<2x8x128xf32> to vector<2x8xf32>
    %144 = vector.shape_cast %143 : vector<2x8xf32> to vector<2x8x1xf32>
    %cst_65 = arith.constant 1.280000e+02 : f32
    %145 = vector.broadcast %cst_65 : f32 to vector<2x8x1xf32>
    %146 = arith.divf %144, %145 : vector<2x8x1xf32>
    %147 = vector.broadcast %146 : vector<2x8x1xf32> to vector<2x8x128xf32>
    %148 = arith.subf %138, %147 : vector<2x8x128xf32>
    %149 = arith.mulf %148, %148 : vector<2x8x128xf32>
    %cst_66 = arith.constant dense<0.000000e+00> : vector<2x8xf32>
    %150 = vector.multi_reduction <add>, %149, %cst_66 [2] : vector<2x8x128xf32> to vector<2x8xf32>
    %151 = vector.shape_cast %150 : vector<2x8xf32> to vector<2x8x1xf32>
    %cst_67 = arith.constant 1.280000e+02 : f32
    %152 = vector.broadcast %cst_67 : f32 to vector<2x8x1xf32>
    %153 = arith.divf %151, %152 : vector<2x8x1xf32>
    %154 = vector.broadcast %146 : vector<2x8x1xf32> to vector<2x8x128xf32>
    %155 = arith.subf %138, %154 : vector<2x8x128xf32>
    %cst_68 = arith.constant 9.99999974E-6 : f32
    %156 = vector.broadcast %cst_68 : f32 to vector<2x8x1xf32>
    %157 = arith.addf %153, %156 : vector<2x8x1xf32>
    %158 = math.rsqrt %157 : vector<2x8x1xf32>
    %159 = vector.broadcast %158 : vector<2x8x1xf32> to vector<2x8x128xf32>
    %160 = arith.mulf %155, %159 : vector<2x8x128xf32>
    %161 = vector.shape_cast %140 : vector<1x128xf32> to vector<1x1x128xf32>
    %162 = vector.broadcast %161 : vector<1x1x128xf32> to vector<2x8x128xf32>
    %163 = arith.mulf %160, %162 : vector<2x8x128xf32>
    %164 = vector.shape_cast %142 : vector<1x128xf32> to vector<1x1x128xf32>
    %165 = vector.broadcast %164 : vector<1x1x128xf32> to vector<2x8x128xf32>
    %166 = arith.addf %163, %165 : vector<2x8x128xf32>
    %167 = vector.shape_cast %166 : vector<2x8x128xf32> to vector<16x128xf32>
    %168 = arith.truncf %167 : vector<16x128xf32> to vector<16x128xbf16>
    %c0_69 = arith.constant 0 : index
    %c0_70 = arith.constant 0 : index
    %c0_71 = arith.constant 0 : index
    %169 = vector.load %arg10[%c0_69, %c0_70, %c0_71] : memref<1x128x512xbf16, #tpu.memory_space<vmem>>, vector<1x128x512xbf16>
    %170 = vector.shape_cast %169 : vector<1x128x512xbf16> to vector<128x512xbf16>
    "tpu.trace_start"() <{level = 10 : i32, message = "mc,ch->mh"}> : () -> ()
    %cst_72 = arith.constant dense<0.000000e+00> : vector<16x512xf32>
    %171 = tpu.matmul %168, %170, %cst_72 {dimension_numbers = #tpu.dot_dimension_numbers<[1], [0], [0], [1], [0, 0, 1, 1], [], []>} : vector<16x128xbf16>, vector<128x512xbf16>, vector<16x512xf32> -> vector<16x512xf32>
    "tpu.trace_stop"() : () -> ()
    %c0_73 = arith.constant 0 : index
    %c0_74 = arith.constant 0 : index
    %c0_75 = arith.constant 0 : index
    %172 = vector.load %arg11[%c0_73, %c0_74, %c0_75] : memref<1x1x512xf32, #tpu.memory_space<vmem>>, vector<1x1x512xf32>
    %173 = vector.shape_cast %172 : vector<1x1x512xf32> to vector<1x512xf32>
    %174 = vector.broadcast %173 : vector<1x512xf32> to vector<16x512xf32>
    %175 = arith.addf %171, %174 : vector<16x512xf32>
    %cst_76 = arith.constant 0.000000e+00 : f32
    %176 = vector.broadcast %cst_76 : f32 to vector<16x512xf32>
    %177 = arith.maximumf %175, %176 : vector<16x512xf32>
    %178 = arith.truncf %177 : vector<16x512xf32> to vector<16x512xbf16>
    %c0_77 = arith.constant 0 : index
    %c0_78 = arith.constant 0 : index
    %c0_79 = arith.constant 0 : index
    %179 = vector.load %arg12[%c0_77, %c0_78, %c0_79] : memref<1x512x128xbf16, #tpu.memory_space<vmem>>, vector<1x512x128xbf16>
    %180 = vector.shape_cast %179 : vector<1x512x128xbf16> to vector<512x128xbf16>
    "tpu.trace_start"() <{level = 10 : i32, message = "mh,ho->mo"}> : () -> ()
    %cst_80 = arith.constant dense<0.000000e+00> : vector<16x128xf32>
    %181 = tpu.matmul %178, %180, %cst_80 {dimension_numbers = #tpu.dot_dimension_numbers<[1], [0], [0], [1], [0, 0, 1, 1], [], []>} : vector<16x512xbf16>, vector<512x128xbf16>, vector<16x128xf32> -> vector<16x128xf32>
    "tpu.trace_stop"() : () -> ()
    %c0_81 = arith.constant 0 : index
    %c0_82 = arith.constant 0 : index
    %c0_83 = arith.constant 0 : index
    %182 = vector.load %arg13[%c0_81, %c0_82, %c0_83] : memref<1x1x128xf32, #tpu.memory_space<vmem>>, vector<1x1x128xf32>
    %183 = vector.shape_cast %182 : vector<1x1x128xf32> to vector<1x128xf32>
    %184 = vector.broadcast %183 : vector<1x128xf32> to vector<16x128xf32>
    %185 = arith.addf %181, %184 : vector<16x128xf32>
    %186 = vector.shape_cast %185 : vector<16x128xf32> to vector<2x8x128xf32>
    %187 = arith.addf %166, %186 : vector<2x8x128xf32>
    %c0_84 = arith.constant 0 : index
    %c0_85 = arith.constant 0 : index
    %c0_86 = arith.constant 0 : index
    %188 = vector.load %arg16[%c0_84, %c0_85, %c0_86] : memref<2x8x128xf32, #tpu.memory_space<vmem>>, vector<2x8x128xf32>
    tpu.vector_store %arg16[%c0_84, %c0_85, %c0_86], %187 {strides = array<i32>} : memref<2x8x128xf32, #tpu.memory_space<vmem>>, vector<2x8x128xf32>,
    %c1_i32 = arith.constant 1 : i32
    %189 = arith.cmpi eq, %arg1, %c1_i32 : i32
    %190 = arith.extui %189 : i1 to i32
    %c0_i32_87 = arith.constant 0 : i32
    %191 = arith.cmpi ne, %190, %c0_i32_87 : i32
    scf.if %191 {
      %c0_88 = arith.constant 0 : index
      %c0_89 = arith.constant 0 : index
      %c0_90 = arith.constant 0 : index
      %192 = vector.load %arg14[%c0_88, %c0_89, %c0_90] : memref<2x8x128xf32, #tpu.memory_space<vmem>>, vector<2x8x128xf32>
      tpu.vector_store %arg14[%c0_88, %c0_89, %c0_90], %187 {strides = array<i32>} : memref<2x8x128xf32, #tpu.memory_space<vmem>>, vector<2x8x128xf32>,
    } else {
    }
    return
  }
  func.func @transform_0(%arg0: i32, %arg1: i32) -> (i32, i32, i32) {
    %c0_i32 = arith.constant 0 : i32
    %c0_i32_0 = arith.constant 0 : i32
    %c0_i32_1 = arith.constant 0 : i32
    return %arg0, %c0_i32, %c0_i32_0 : i32, i32, i32
  }
  func.func @transform_1(%arg0: i32, %arg1: i32) -> (i32, i32, i32) {
    %c0_i32 = arith.constant 0 : i32
    %c0_i32_0 = arith.constant 0 : i32
    %c0_i32_1 = arith.constant 0 : i32
    return %arg1, %c0_i32, %c0_i32_0 : i32, i32, i32
  }
  func.func @transform_2(%arg0: i32, %arg1: i32) -> (i32, i32, i32) {
    %c0_i32 = arith.constant 0 : i32
    %c0_i32_0 = arith.constant 0 : i32
    %c0_i32_1 = arith.constant 0 : i32
    return %arg1, %c0_i32, %c0_i32_0 : i32, i32, i32
  }
  func.func @transform_3(%arg0: i32, %arg1: i32) -> (i32, i32, i32) {
    %c0_i32 = arith.constant 0 : i32
    %c0_i32_0 = arith.constant 0 : i32
    %c0_i32_1 = arith.constant 0 : i32
    return %arg1, %c0_i32, %c0_i32_0 : i32, i32, i32
  }
  func.func @transform_4(%arg0: i32, %arg1: i32) -> (i32, i32, i32) {
    %c0_i32 = arith.constant 0 : i32
    %c0_i32_0 = arith.constant 0 : i32
    %c0_i32_1 = arith.constant 0 : i32
    return %arg1, %c0_i32, %c0_i32_0 : i32, i32, i32
  }
  func.func @transform_5(%arg0: i32, %arg1: i32) -> (i32, i32, i32) {
    %c0_i32 = arith.constant 0 : i32
    %c0_i32_0 = arith.constant 0 : i32
    %c0_i32_1 = arith.constant 0 : i32
    return %arg1, %c0_i32, %c0_i32_0 : i32, i32, i32
  }
  func.func @transform_6(%arg0: i32, %arg1: i32) -> (i32, i32, i32) {
    %c0_i32 = arith.constant 0 : i32
    %c0_i32_0 = arith.constant 0 : i32
    %c0_i32_1 = arith.constant 0 : i32
    return %arg1, %c0_i32, %c0_i32_0 : i32, i32, i32
  }
  func.func @transform_7(%arg0: i32, %arg1: i32) -> (i32, i32, i32) {
    %c0_i32 = arith.constant 0 : i32
    %c0_i32_0 = arith.constant 0 : i32
    %c0_i32_1 = arith.constant 0 : i32
    return %arg1, %c0_i32, %c0_i32_0 : i32, i32, i32
  }
  func.func @transform_8(%arg0: i32, %arg1: i32) -> (i32, i32, i32) {
    %c0_i32 = arith.constant 0 : i32
    %c0_i32_0 = arith.constant 0 : i32
    %c0_i32_1 = arith.constant 0 : i32
    return %arg1, %c0_i32, %c0_i32_0 : i32, i32, i32
  }
  func.func @transform_9(%arg0: i32, %arg1: i32) -> (i32, i32, i32) {
    %c0_i32 = arith.constant 0 : i32
    %c0_i32_0 = arith.constant 0 : i32
    %c0_i32_1 = arith.constant 0 : i32
    return %arg1, %c0_i32, %c0_i32_0 : i32, i32, i32
  }
  func.func @transform_10(%arg0: i32, %arg1: i32) -> (i32, i32, i32) {
    %c0_i32 = arith.constant 0 : i32
    %c0_i32_0 = arith.constant 0 : i32
    %c0_i32_1 = arith.constant 0 : i32
    return %arg1, %c0_i32, %c0_i32_0 : i32, i32, i32
  }
  func.func @transform_11(%arg0: i32, %arg1: i32) -> (i32, i32, i32) {
    %c0_i32 = arith.constant 0 : i32
    %c0_i32_0 = arith.constant 0 : i32
    %c0_i32_1 = arith.constant 0 : i32
    return %arg1, %c0_i32, %c0_i32_0 : i32, i32, i32
  }
  func.func @transform_12(%arg0: i32, %arg1: i32) -> (i32, i32, i32) {
    %c0_i32 = arith.constant 0 : i32
    %c0_i32_0 = arith.constant 0 : i32
    %c0_i32_1 = arith.constant 0 : i32
    return %arg0, %c0_i32, %c0_i32_0 : i32, i32, i32
  }
  func.func @transform_13(%arg0: i32, %arg1: i32) -> (i32, i32, i32, i32, i32) {
    %c0_i32 = arith.constant 0 : i32
    %c0_i32_0 = arith.constant 0 : i32
    %c0_i32_1 = arith.constant 0 : i32
    %c0_i32_2 = arith.constant 0 : i32
    return %arg1, %c0_i32, %arg0, %c0_i32_0, %c0_i32_1 : i32, i32, i32, i32, i32
  }
}

</mosaic_0001>

<bundles_post_ra>
// kernel: tpu_custom_call.1
= control target key start
LH: loop header
LB: loop body
LE: loop exit
PB: predicated region body
PF: predicated region fallthrough
CT: control target
= control target key end

     0   :  { %s4876_s0 = inlined_call_operand.hbm [shape: f32[2,8,128], index: 0, kind: input, shape index: {}]   ;;  %s4877_s1 = inlined_call_operand.vmem [shape: f32[2,1,128], index: 1, kind: input, shape index: {}]   ;;  %s4878_s2 = inlined_call_operand.vmem [shape: f32[2,1,128], index: 2, kind: input, shape index: {}]   ;;  %s4879_s3 = inlined_call_operand.hbm [shape: bf16[2,128,384], index: 3, kind: input, shape index: {}]   ;;  %s4880_s4 = inlined_call_operand.hbm [shape: bf16[2,128,128], index: 4, kind: input, shape index: {}]   ;;  %s4881_s5 = inlined_call_operand.vmem [shape: f32[2,1,128], index: 5, kind: input, shape index: {}]   ;;  %s4882_s6 = inlined_call_operand.vmem [shape: f32[2,1,128], index: 6, kind: input, shape index: {}]   ;;  %s4883_s7 = inlined_call_operand.vmem [shape: f32[2,1,128], index: 7, kind: input, shape index: {}]   ;;  %s4884_s8 = inlined_call_operand.hbm [shape: bf16[2,128,512], index: 8, kind: input, shape index: {}]   ;;  %s4885_s9 = inlined_call_operand.vmem [shape: f32[2,1,512], index: 9, kind: input, shape index: {}]   ;;  %s4886_s10 = inlined_call_operand.hbm [shape: bf16[2,512,128], index: 10, kind: input, shape index: {}]   ;;  %s4887_s11 = inlined_call_operand.vmem [shape: f32[2,1,128], index: 11, kind: input, shape index: {}]   ;;  %s4888_s12 = inlined_call_operand.hbm [shape: f32[2,8,128], index: 12, kind: output, shape index: {0}]   ;;  %s4889_s13 = inlined_call_operand.hbm [shape: f32[2,4,2,8,8], index: 13, kind: output, shape index: {1}]  }
   0x1   :  { %4914 = sst [smem:[#allocation30_spill]] %s4876_s0 }
   0x2   :  { %4915 = sst [smem:[#allocation31_spill]] %s4879_s3 }
   0x3   :  { %4916 = sst [smem:[#allocation32_spill]] %s4880_s4 }
   0x4   :  { %4917 = sst [smem:[#allocation33_spill]] %s4882_s6 }
   0x5   :  { %4918 = sst [smem:[#allocation34_spill]] %s4883_s7 }
   0x6   :  { %4919 = sst [smem:[#allocation35_spill]] %s4884_s8 }
   0x7   :  { %4920 = sst [smem:[#allocation36_spill]] %s4885_s9 }
   0x8   :  { %4921 = sst [smem:[#allocation37_spill]] %s4886_s10 }
   0x9   :  { %4922 = sst [smem:[#allocation38_spill]] %s4887_s11 }
   0xa   :  { %4923 = sst [smem:[#allocation39_spill]] %s4888_s12 }
   0xb   :  { %4924 = sst [smem:[#allocation40_spill]] %s4889_s13 }
   0xc   :  { %19 = vsyncpa [#allocation4], 0 }
   0xd   :  { %20 = vsyncpa [#allocation7], 0 }
   0xe   :  { %22 = vsyncpa [#allocation7 + $0x1], 0 }
   0xf   :  { %23 = vsyncpa [#allocation10], 0 }
  0x10   :  { %25 = vsyncpa [#allocation10 + $0x1], 0 }
  0x11   :  { %26 = vsyncpa [#allocation5], 0 }
  0x12   :  { %27 = vsyncpa [#allocation14], 0 }
  0x13   :  { %29 = vsyncpa [#allocation14 + $0x1], 0  ;;  %s4084_s25 = smov 0   ;;  %s4086_s26 = smov 0  }
  0x14   :  { %s4088_s27 = smov 0   ;;  %s4090_s28 = smov 0  }
  0x15   :  { %s4092_s29 = smov 0   ;;  %s4094_s30 = smov 0  }
  0x16 LB: > { %4925 = sst [smem:[#allocation20_spill]] %s3969_s25  ;;  %s44_s14 = sadd.s32 1, %s3985_s29  ;;  %s3989_s30 = sphi %s4094_s30, %s35_s30   ;;  %s3985_s29 = sphi %s4092_s29, %s4984_s29   ;;  %s3981_s28 = sphi %s4090_s28, %s4983_s28   ;;  %s3977_s27 = sphi %s4088_s27, %s4982_s27   ;;  %s3973_s26 = sphi %s4086_s26, %s4981_s26   ;;  %s3969_s25 = sphi %s4084_s25, %s4980_s25  }
  0x17   : > { %4926 = sst [smem:[#allocation21_spill]] %s3973_s26  ;;  %s132_s15 = sadd.s32 1, %s3977_s27 }
  0x18   : > { %4927 = sst [smem:[#allocation22_spill]] %s3977_s27  ;;  %p45_p0 = scmp.ge.s32.totalorder %s44_s14, 2 }
  0x19   : > { %4928 = sst [smem:[#allocation23_spill]] %s3985_s29  ;;  %p4893_p1 = scmp.ne.s32.totalorder %s3977_s27, %s3973_s26 }
  0x1a   : > { %4929 = sst [smem:[#allocation24_spill]] %s3989_s30  ;;  %p140_p2 = scmp.eq.s32.totalorder %s3989_s30, 0 }
  0x1b   : > { %s4986_s14 = smov (%p45_p0, %s44_s14), 0  ;;  %p3488_p5 = scmp.lt.s32.totalorder %s3989_s30, 2 }
  0x1c   : > { %4930 = sst [smem:[#allocation25_spill]] %s4986_s14  ;;  %p141_p4 = por %p140_p2, %p4893_p1 }
  0x1d   : > { %s129_s16 = ssub.s32 %s3985_s29, %s4986_s14  ;;  %s4130_s18 = sand.u32 1, %s3977_s27  }
  0x1e   : > { %p130_p6 = scmp.eq.s32.totalorder %s129_s16, 0  ;;  %s3446_s19 = smul.u32 3072, %s3985_s29 }
  0x1f   : > { %s3445_s21 = smul.u32 192, %s4130_s18  ;;  %s4932_s3 = sld [smem:[#allocation31_spill]] }
  0x20   : > { %s4134_s20 = scalar_select %p130_p6, %s3977_s27, %s132_s15  }
  0x21   : > { %p4142_p7 = pnand %p3488_p5, %p141_p4  ;;  %s463_s16 = scalar_lea.vmem [#allocation6], %s3445_s21 }
  0x22   : > { %4931 = sst [smem:[#allocation26_spill]] %s4134_s20  ;;  %s470_s17 = sshll.u32 %s463_s16, 4  ;;  %s4146_s17 = int_to_ptr.vmem [resolvable:$true] %s470_s17 }
  0x23   : > { %s4933_s14 = scalar_select %p4142_p7, 1, 0 }
  0x24   : > { %s4934_s15 = sand.u32 1, %s3989_s30   ;;  %p4156_p9 = pneg %p4142_p7 }
  0x25   : > { %s4140_s24 = scalar_lea.hbm %s4932_s3, %s3446_s19  ;;  %s4150_s20 = scalar_lea.sflag [#allocation7], %s4934_s15 }
  0x26   : > { %s3721_s13 = scalar_lea.hbm %s4140_s24, 3072  ;;  %s3726_s21 = scalar_lea.hbm %s4932_s3, 6144 }
  0x27   : > { %p3722_p8 = scmp.ne.s32.totalorder %s4140_s24, %s3721_s13  ;;  %p3727_p12 = scmp.lt.u32.totalorder %s4140_s24, %s4932_s3 }
  0x28   : > { %s4935_s19 = scalar_select %p4156_p9, 1, 0 }
  0x29   : > { %p3724_p10 = pnand %p4156_p9, %p3722_p8  ;;  %p3728_p13 = scmp.lt.u32.totalorder %s3726_s21, %s3721_s13 }
  0x2a   : > { %p3730_p2 = scmp.lt.u32.totalorder %s3721_s13, %s4140_s24 }
  0x2b   : > { %p3725_p11 = pneg %p3724_p10  ;;  %p3729_p0 = por %p3728_p13, %p3727_p12 }
  0x2d   : > { %p3731_p4 = por %p3730_p2, %p3729_p0 }
  0x2f   : > { %p3732_p5 = pnand %p3731_p4, %p3725_p11 }
  0x31   : > { %3735 = shalt.err (!%p3732_p5)
}
  0x32   : > { %s3736_s15 = scalar_lea.vmem %s4146_s17, 3072  ;;  %s3991_s22 = smov [#allocation6]  }
  0x33   : > { %p3737_p6 = scmp.ne.s32.totalorder %s4146_s17, %s3736_s15  ;;  %s3741_s23 = sshll.u32 %s3991_s22, 4  ;;  %s3742_s23 = int_to_ptr.vmem [resolvable:$false] %s3741_s23 }
  0x34   : > { %s3743_s12 = scalar_lea.vmem %s3742_s23, 6144  ;;  %p3744_p3 = scmp.lt.s32.totalorder %s4146_s17, %s3742_s23 }
  0x35   : > { %p3739_p8 = pnand %p3737_p6, %p4156_p9  ;;  %p3745_p1 = scmp.lt.s32.totalorder %s3743_s12, %s3736_s15 }
  0x37   : > { %p3740_p10 = pneg %p3739_p8  ;;  %p3746_p12 = por %p3745_p1, %p3744_p3 }
  0x39   : > { %p3747_p13 = pnand %p3746_p12, %p3740_p10 }
  0x3b   : > { %3750 = shalt.err (!%p3747_p13)
}
  0x3c   : > { %s3992_s13 = smov 192   ;;  %s3993_s21 = smov 12  }
  0x3d   : > { %3473 = dma.hbm_to_vmem [thread:$0]  (!%p4142_p7), %s4140_s24, 3072, %s4146_s17, %s4150_s20, %s3992_s13, %s3992_s13, %s3993_s21  }
  0x3e   : > { %s3064_s16 = sshll.u32 %s4130_s18, 8  ;;  %s3212_s22 = sshll.u32 %s3985_s29, 12 }
  0x3f   : > { %s4936_s8 = sld [smem:[#allocation35_spill]]  ;;  %s523_s3 = scalar_lea.vmem [#allocation9], %s3064_s16 }
  0x40   : > { %s530_s11 = sshll.u32 %s523_s3, 4  ;;  %s4937_s9 = sand.u32 1, %s3989_s30   ;;  %s4191_s11 = int_to_ptr.vmem [resolvable:$true] %s530_s11 }
  0x41   : > { %s4195_s7 = scalar_lea.sflag [#allocation10], %s4937_s9 }
  0x45   : > { %s4187_s12 = scalar_lea.hbm %s4936_s8, %s3212_s22  ;;  %s3756_s21 = scalar_lea.hbm %s4936_s8, 8192 }
  0x46   : > { %s3751_s17 = scalar_lea.hbm %s4187_s12, 4096  ;;  %p3757_p0 = scmp.lt.u32.totalorder %s4187_s12, %s4936_s8 }
  0x47   : > { %p3752_p1 = scmp.ne.s32.totalorder %s4187_s12, %s3751_s17  ;;  %p3758_p2 = scmp.lt.u32.totalorder %s3756_s21, %s3751_s17 }
  0x48   : > { %p3760_p5 = scmp.lt.u32.totalorder %s3751_s17, %s4187_s12 }
  0x49   : > { %p3754_p3 = pnand %p3752_p1, %p4156_p9  ;;  %p3759_p4 = por %p3758_p2, %p3757_p0 }
  0x4b   : > { %p3755_p11 = pneg %p3754_p3  ;;  %p3761_p6 = por %p3760_p5, %p3759_p4 }
  0x4d   : > { %p3762_p8 = pnand %p3761_p6, %p3755_p11 }
  0x4f   : > { %3765 = shalt.err (!%p3762_p8)
}
  0x50   : > { %s3766_s3 = scalar_lea.vmem %s4191_s11, 4096  ;;  %s3994_s9 = smov [#allocation9]  }
  0x51   : > { %p3767_p10 = scmp.ne.s32.totalorder %s4191_s11, %s3766_s3  ;;  %s3771_s24 = sshll.u32 %s3994_s9, 4  ;;  %s3772_s24 = int_to_ptr.vmem [resolvable:$false] %s3771_s24 }
  0x52   : > { %s3773_s13 = scalar_lea.vmem %s3772_s24, 8192  ;;  %p3774_p1 = scmp.lt.s32.totalorder %s4191_s11, %s3772_s24 }
  0x53   : > { %p3769_p12 = pnand %p3767_p10, %p4156_p9  ;;  %p3775_p3 = scmp.lt.s32.totalorder %s3773_s13, %s3766_s3 }
  0x55   : > { %p3770_p13 = pneg %p3769_p12  ;;  %p3776_p0 = por %p3775_p3, %p3774_p1 }
  0x57   : > { %p3777_p2 = pnand %p3776_p0, %p3770_p13 }
  0x59   : > { %3780 = shalt.err (!%p3777_p2)
}
  0x5a   : > { %s3995_s17 = smov 256   ;;  %s3996_s21 = smov 16  }
  0x5b   : > { %3479 = dma.hbm_to_vmem [thread:$0]  (!%p4142_p7), %s4187_s12, 4096, %s4191_s11, %s4195_s7, %s3995_s17, %s3995_s17, %s3996_s21  }
  0x5c   : > { %s4938_s10 = sld [smem:[#allocation37_spill]]  ;;  %s551_s9 = scalar_lea.vmem [#allocation11], %s3064_s16 }
  0x5d   : > { %s558_s24 = sshll.u32 %s551_s9, 4  ;;  %s4231_s13 = sadd.s32 4294967295, %s3989_s30   ;;  %s4228_s24 = int_to_ptr.vmem [resolvable:$true] %s558_s24 }
  0x5e   : > { %s3056_s8 = sadd.s32 4294967294, %s3989_s30   ;;  %p145_p11 = scmp.ne.s32.totalorder %s3973_s26, %s3969_s25 }
  0x5f   : > { %p4903_p4 = scmp.eq.s32.totalorder %s4231_s13, 0  ;;  %p4902_p5 = scmp.eq.s32.totalorder %s4231_s13, 1 }
  0x60   : > { %p411_p6 = scmp.eq.s32.totalorder %s3056_s8, 1  ;;  %p3057_p10 = scmp.ge.s32.totalorder %s3989_s30, 1 }
  0x61   : > { %p4240_p8 = por %p4903_p4, %p145_p11  ;;  %p4940_p12 = scmp.ne.s32.totalorder %s3977_s27, %s3973_s26 }
  0x62   : > { %s4224_s3 = scalar_lea.hbm %s4938_s10, %s3212_s22  ;;  %p4254_p1 = por %p411_p6, %p145_p11 }
  0x63   : > { %s4939_s11 = scalar_select %p4240_p8, 1, 0 }
  0x64   : > { %p4250_p13 = por %p4902_p5, %p4940_p12  ;;  %p418_p3 = scmp.lt.s32.totalorder %s3989_s30, 3 }
  0x65   : > { %s4943_s22 = scalar_select %p4254_p1, 1, 0 }
  0x66   : > { %s4941_s16 = scalar_select %p4250_p13, 1, 0 }
  0x67   : > { %4944 = sst [smem:[#allocation28_spill]] %s4943_s22  ;;  %p4259_p0 = pnand %p3057_p10, %p418_p3 }
  0x68   : > { %4942 = sst [smem:[#allocation27_spill]] %s4941_s16  ;;  %s3997_s8 = smov [#allocation3]  }
  0x69   : > { %s4945_s12 = scalar_select %p4259_p0, 1, 0 }
  0x6a   : > { %s433_s17 = sshll.u32 %s3997_s8, 4  ;;  %p3466_p2 = pneg %p4259_p0  ;;  %s4263_s17 = int_to_ptr.vmem [resolvable:$true] %s433_s17 }
  0x6b   : > { %s3061_s21 = sshll.u32 %s4130_s18, 6  ;;  %s3211_s15 = sshll.u32 %s3985_s29, 10 }
  0x6c   : > { %p4271_p12 = pnand %p3466_p2, %p4903_p4  ;;  %s4947_s4 = sld [smem:[#allocation32_spill]] }
  0x6d   : > { %s484_s22 = scalar_lea.vmem [#allocation8], %s3061_s21  ;;  %s4948_s0 = sld [smem:[#allocation30_spill]] }
  0x6e   : > { %s491_s25 = sshll.u32 %s484_s22, 4  ;;  %p3783_p6 = pneg %p4271_p12  ;;  %s4280_s25 = int_to_ptr.vmem [resolvable:$true] %s491_s25 }
  0x72   : > { %s4278_s30 = scalar_lea.hbm %s4947_s4, %s3211_s15 }
  0x73   : > { %s3781_s18 = scalar_lea.hbm %s4948_s0, 256 }
  0x74   : > { %p3782_p11 = scmp.ne.s32.totalorder %s4948_s0, %s3781_s18  ;;  %p3788_p2 = scmp.lt.u32.totalorder %s3781_s18, %s4948_s0 }
  0x76   : > { %p3784_p10 = pnand %p3783_p6, %p3782_p11 }
  0x78   : > { %p3785_p3 = pneg %p3784_p10 }
  0x7a   : > { %p3790_p5 = pnand %p3788_p2, %p3785_p3 }
  0x7c   : > { %3793 = shalt.err (!%p3790_p5)
}
  0x7d   : > { %s3794_s22 = scalar_lea.vmem %s4263_s17, 256  ;;  %p3802_p8 = scmp.lt.s32.totalorder %s4263_s17, %s4263_s17 }
  0x7e   : > { %p3795_p4 = scmp.ne.s32.totalorder %s4263_s17, %s3794_s22  ;;  %p3803_p0 = scmp.lt.s32.totalorder %s3794_s22, %s3794_s22 }
  0x80   : > { %p3797_p1 = pnand %p3795_p4, %p3783_p6  ;;  %p3804_p7 = por %p3803_p0, %p3802_p8 }
  0x82   : > { %p3798_p13 = pneg %p3797_p1 }
  0x84   : > { %p3805_p9 = pnand %p3804_p7, %p3798_p13 }
  0x86   : > { %3808 = shalt.err (!%p3805_p9)
}
  0x87   : > { %s3998_s6 = smov 128   ;;  %s3999_s29 = smov 8  }
  0x88   : > { %3469 = dma.hbm_to_vmem [thread:$0]  (!%p4271_p12), %s4948_s0, 256, %s4263_s17, [#allocation4], %s3998_s6, %s3998_s6, %s3999_s29  }
  0x89   : > { %s3809_s15 = scalar_lea.hbm %s4278_s30, 1024  ;;  %p4949_p5 = scmp.ne.s32.totalorder %s4935_s19, 0 }
  0x8a   : > { %p3810_p4 = scmp.ne.s32.totalorder %s4278_s30, %s3809_s15  ;;  %s3814_s27 = scalar_lea.hbm %s4947_s4, 2048 }
  0x8b   : > { %p3815_p9 = scmp.lt.u32.totalorder %s4278_s30, %s4947_s4  ;;  %p3816_p13 = scmp.lt.u32.totalorder %s3814_s27, %s3809_s15 }
  0x8c   : > { %p3812_p8 = pnand %p3810_p4, %p4949_p5  ;;  %p3818_p0 = scmp.lt.u32.totalorder %s3809_s15, %s4278_s30 }
  0x8d   : > { %p3817_p1 = por %p3816_p13, %p3815_p9 }
  0x8e   : > { %p3813_p7 = pneg %p3812_p8 }
  0x8f   : > { %p3819_p11 = por %p3818_p0, %p3817_p1 }
  0x91   : > { %p3820_p6 = pnand %p3819_p11, %p3813_p7 }
  0x93   : > { %3823 = shalt.err (!%p3820_p6)
}
  0x94   : > { %s3824_s17 = scalar_lea.vmem %s4280_s25, 1024  ;;  %s4000_s23 = smov [#allocation8]  }
  0x95   : > { %p3825_p12 = scmp.ne.s32.totalorder %s4280_s25, %s3824_s17  ;;  %s3829_s6 = sshll.u32 %s4000_s23, 4  ;;  %s3830_s6 = int_to_ptr.vmem [resolvable:$false] %s3829_s6 }
  0x96   : > { %s3831_s29 = scalar_lea.vmem %s3830_s6, 2048  ;;  %p3832_p2 = scmp.lt.s32.totalorder %s4280_s25, %s3830_s6 }
  0x97   : > { %p3827_p10 = pnand %p3825_p12, %p4949_p5  ;;  %p3833_p4 = scmp.lt.s32.totalorder %s3831_s29, %s3824_s17 }
  0x99   : > { %p3828_p3 = pneg %p3827_p10  ;;  %p3834_p8 = por %p3833_p4, %p3832_p2 }
  0x9b   : > { %p3835_p9 = pnand %p3834_p8, %p3828_p3 }
  0x9d   : > { %3838 = shalt.err (!%p3835_p9)
}
  0x9e   : > { %s4001_s16 = smov 64   ;;  %s4002_s21 = smov 4  }
  0x9f   : > { %p4950_p7 = scmp.ne.s32.totalorder %s4933_s14, 0  ;;  %s3839_s15 = scalar_lea.hbm %s4224_s3, 4096 }
  0xa0   : > { %p3840_p13 = scmp.ne.s32.totalorder %s4224_s3, %s3839_s15  ;;  %s3844_s27 = scalar_lea.hbm %s4938_s10, 8192 }
  0xa1   : > { %3476 = dma.hbm_to_vmem [thread:$0]  (!%p4950_p7), %s4278_s30, 1024, %s4280_s25, %s4150_s20, %s4001_s16, %s4001_s16, %s4002_s21  }
  0xa2   : > { %p3842_p1 = pnand %p3840_p13, %p4949_p5  ;;  %p3845_p11 = scmp.lt.u32.totalorder %s4224_s3, %s4938_s10 }
  0xa3   : > { %p3846_p6 = scmp.lt.u32.totalorder %s3844_s27, %s3839_s15  ;;  %p3848_p10 = scmp.lt.u32.totalorder %s3839_s15, %s4224_s3 }
  0xa4   : > { %p3843_p0 = pneg %p3842_p1 }
  0xa5   : > { %p3847_p12 = por %p3846_p6, %p3845_p11 }
  0xa7   : > { %p3849_p3 = por %p3848_p10, %p3847_p12 }
  0xa9   : > { %p3850_p2 = pnand %p3849_p3, %p3843_p0 }
  0xab   : > { %3853 = shalt.err (!%p3850_p2)
}
  0xac   : > { %s3854_s25 = scalar_lea.vmem %s4228_s24, 4096  ;;  %s4003_s30 = smov [#allocation11]  }
  0xad   : > { %p3855_p4 = scmp.ne.s32.totalorder %s4228_s24, %s3854_s25  ;;  %s3859_s20 = sshll.u32 %s4003_s30, 4  ;;  %s3860_s20 = int_to_ptr.vmem [resolvable:$false] %s3859_s20 }
  0xae   : > { %s3861_s17 = scalar_lea.vmem %s3860_s20, 8192  ;;  %p3862_p13 = scmp.lt.s32.totalorder %s4228_s24, %s3860_s20 }
  0xaf   : > { %p3857_p8 = pnand %p3855_p4, %p4949_p5  ;;  %p3863_p1 = scmp.lt.s32.totalorder %s3861_s17, %s3854_s25 }
  0xb1   : > { %p3858_p9 = pneg %p3857_p8  ;;  %p3864_p11 = por %p3863_p1, %p3862_p13 }
  0xb3   : > { %p3865_p6 = pnand %p3864_p11, %p3858_p9 }
  0xb5   : > { %3868 = shalt.err (!%p3865_p6)
}
  0xb6   : > { %3482 = dma.hbm_to_vmem [thread:$0]  (!%p4950_p7), %s4224_s3, 4096, %s4228_s24, %s4195_s7, %s4001_s16, %s4001_s16, %s4002_s21  }
  0xb7   : > { %p4951_p5 = scmp.ne.s32.totalorder %s4945_s12, 0 }
  0xb9   : > { %576 = sbr.rel (%p4951_p5) target bundleno = 4282 (0x10ba), region = 68 }
  0xc0   : > { %p4952_p0 = scmp.eq.s32.totalorder %s4231_s13, 0 }
  0xc2   : > { %3948 = dma.done.wait (%p4952_p0), [#allocation4], 256   ;;  %p4953_p12 = pmov %p4952_p0 }
  0xc3   : > { %s582_s14 = sand.u32 1, %s4231_s13   ;;  %s4361_s19 = sand.u32 1, %s3973_s26  }
  0xc4   : > { %3950 = vsyncadd (%p4953_p12), [#allocation4], 4294967040  ;;  %4954 = sst [smem:[#allocation29_spill]] %s4361_s19  ;;  %s3447_s23 = smul.u32 192, %s4361_s19 }
  0xc5   : > { %s583_s6 = scalar_lea.sflag [#allocation7], %s582_s14  ;;  %p4955_p7 = scmp.ne.s32.totalorder %s4939_s11, 0 }
  0xc6   : > { %s4364_s29 = scalar_lea.vmem [#allocation6], %s3447_s23 }
  0xc7   : > { %3952 = dma.done.wait (%p4955_p7), %s583_s6, 4096  }
  0xc8   : > { %3954 = vsyncadd (%p4955_p7), %s583_s6, 4294963200  ;;  %s3072_s7 = sshll.u32 %s4361_s19, 6  ;;  %s3073_s3 = sshll.u32 %s4361_s19, 8 }
  0xc9   : > { %s4372_s24 = scalar_lea.vmem [#allocation8], %s3072_s7  ;;  %s601_s12 = scalar_lea.sflag [#allocation10], %s582_s14 }
  0xca   : > { %s4374_s16 = scalar_lea.vmem [#allocation9], %s3073_s3 }
  0xcb   : > { %3956 = dma.done.wait (%p4955_p7), %s601_s12, 8192  }
  0xcc   : > { %3958 = vsyncadd (%p4955_p7), %s601_s12, 4294959104  ;;  %p694_p10 = scmp.lt.s32.totalorder %s3981_s28, 1  ;;  %s4956_s14 = sld [smem:[#allocation33_spill]] }
  0xcd   : > { %s4957_s15 = sld [smem:[#allocation34_spill]]  ;;  %s4958_s18 = sld [smem:[#allocation36_spill]] }
  0xce   : > { %s4382_s21 = scalar_select %p694_p10, %s3981_s28, 1 }
  0xcf   : > { %s4959_s11 = sld [smem:[#allocation38_spill]]  ;;  %s4414_s22 = scalar_lea.vmem [#allocation11], %s3073_s3 }
  0xd0   : > { %s702_s30 = scalar_lea.vmem %s4881_s5, %s4382_s21  ;;  %s3076_s0 = sshll.u32 %s4382_s21, 2 }
  0xd1   : > { %s4416_s25 = scalar_lea.vmem [#allocation13], %s3072_s7  ;;  %p3077_p3 = scmp.ne.s32.totalorder %s3981_s28, 0 }
  0xd2   : > { %s705_s23 = scalar_lea.vmem %s4956_s14, %s4382_s21  ;;  %v723_v0 = vld [vmem:[#allocation3] sm:$0xff] (!%p3077_p3)  ;;  %v724_v1 = vld [vmem:[#allocation3 + $0x8] sm:$0xff] (!%p3077_p3) }
  0xd3   : > { %s708_s8 = scalar_lea.vmem %s4957_s15, %s4382_s21  ;;  %s4408_s26 = scalar_lea.vmem %s4958_s18, %s3076_s0  ;;  %725 = vst [vmem:[#allocation2] sm:$0xff] (!%p3077_p3), %v723_v0  ;;  %726 = vst [vmem:[#allocation2 + $0x8] sm:$0xff] (!%p3077_p3), %v724_v1 }
  0xd4   : > { %722 = sbr.rel (%p3077_p3) target bundleno = 219 (0xdb), region = 92 }
  0xd5   : > { %s715_s19 = scalar_lea.vmem %s4959_s11, %s4382_s21 }
  0xdb PF: > { %v727_v2 = vld [vmem:[#allocation2] sm:$0xff]  ;;  %v728_v3 = vld [vmem:[#allocation2 + $0x8] sm:$0xff]  ;;  %v4004_v6 = vmov 0.0   ;;  %v3569_v20 = vld [vmem:[%s4364_s29 + $0x30] ss:$12 sps:$4 sm:$0xff]   ;;  %v4005_v32 = vmov 0   ;;  %s4960_s10 = scalar_lea.vmem %s4877_s1, %s4382_s21  ;;  %s4961_s3 = scalar_lea.vmem %s4878_s2, %s4382_s21 }
  0xdc   : > { %731 = vadd.xlane.f32.xlu0 %v727_v2  ;;  %v3559_v4 = vld [vmem:[%s4364_s29 + $0x4] ss:$12 sps:$4 sm:$0xff]   ;;  %v3561_v5 = vld [vmem:[%s4364_s29] ss:$12 sps:$4 sm:$0xff]   ;;  %3309 = vmatprep.subr.bf16.mxu1 %v4004_v6  ;;  %v3562_v7 = vld [vmem:[%s4364_s29 + $0x8] ss:$12 sps:$4 sm:$0xff]  }
  0xdd   : > { %v3563_v8 = vld [vmem:[%s4364_s29 + $0x1c] ss:$12 sps:$4 sm:$0xff]   ;;  %931 = vmatprep.subr.bf16.mxu0 %v3559_v4  ;;  %3310 = vmatpush3.bf16.msra.mxu1 %v3562_v7  ;;  %v3565_v17 = vld [vmem:[%s4364_s29 + $0x18] ss:$12 sps:$4 sm:$0xff]   ;;  %v3566_v18 = vld [vmem:[%s4364_s29 + $0x20] ss:$12 sps:$4 sm:$0xff]  }
  0xde   : > { %932 = vmatpush1.bf16.msra.mxu0 %v3561_v5  ;;  %3311 = vmatprep.subr.bf16.mxu1 %v4004_v6  ;;  %v3567_v19 = vld [vmem:[%s4364_s29 + $0x34] ss:$12 sps:$4 sm:$0xff]   ;;  %v3570_v21 = vld [vmem:[%s4364_s29 + $0x38] ss:$12 sps:$4 sm:$0xff]   ;;  %v3574_v24 = vld [vmem:[%s4364_s29 + $0x50] ss:$12 sps:$4 sm:$0xff]  }
  0xdf   : > { %933 = vmatprep.subr.bf16.mxu0 %v3563_v8  ;;  %v3571_v22 = vld [vmem:[%s4364_s29 + $0x4c] ss:$12 sps:$4 sm:$0xff]   ;;  %v3573_v23 = vld [vmem:[%s4364_s29 + $0x48] ss:$12 sps:$4 sm:$0xff]   ;;  %v3575_v25 = vld [vmem:[%s4364_s29 + $0x64] ss:$12 sps:$4 sm:$0xff]   ;;  %963 = vmatprep.mubr.bf16.mxu0 %v4005_v32 }
  0xe0   : > { %733 = vadd.xlane.f32.xlu0 %v728_v3  ;;  %v3577_v26 = vld [vmem:[%s4364_s29 + $0x60] ss:$12 sps:$4 sm:$0xff]   ;;  %v3578_v27 = vld [vmem:[%s4364_s29 + $0x68] ss:$12 sps:$4 sm:$0xff]   ;;  %v3581_v29 = vld [vmem:[%s4364_s29 + $0x78] ss:$12 sps:$4 sm:$0xff]  }
  0xe1   : > { %3312 = vmatpush3.bf16.msra.mxu1 %v3566_v18  ;;  %v3579_v28 = vld [vmem:[%s4364_s29 + $0x7c] ss:$12 sps:$4 sm:$0xff]   ;;  %v3582_v30 = vld [vmem:[%s4364_s29 + $0x80] ss:$12 sps:$4 sm:$0xff]   ;;  %vm4006_vm0 = vmmov 0   ;;  %vm1023_vm1 = vcmask 261120  }
  0xe2   : > { %934 = vmatpush1.bf16.msra.mxu0 %v3565_v17  ;;  %3313 = vmatprep.subr.bf16.mxu1 %v4004_v6  ;;  %v3583_v31 = vld [vmem:[%s4364_s29 + $0x94] ss:$12 sps:$4 sm:$0xff]   ;;  %v3585_v33 = vld [vmem:[%s4364_s29 + $0x90] ss:$12 sps:$4 sm:$0xff]   ;;  %v3586_v34 = vld [vmem:[%s4364_s29 + $0x98] ss:$12 sps:$4 sm:$0xff]  }
  0xe3   : > { %935 = vmatprep.subr.bf16.mxu0 %v3567_v19  ;;  %3325 = vmatprep.mubr.msk.bf16.mxu1 %vm4006_vm0, %v4004_v6  ;;  %v3587_v35 = vld [vmem:[%s4364_s29 + $0xac] ss:$12 sps:$4 sm:$0xff]   ;;  %v3589_v36 = vld [vmem:[%s4364_s29 + $0xa8] ss:$12 sps:$4 sm:$0xff]   ;;  %v3590_v37 = vld [vmem:[%s4364_s29 + $0xb0] ss:$12 sps:$4 sm:$0xff]  }
  0xe4   : > { %v3078_v46 = vld [vmem:[%s4960_s10] ss:$0 sm:$0xff]  ;;  %vm1146_vm2 = vcmask 1043456   ;;  %vm1116_vm3 = vcmask 64512   ;;  %s4007_s18 = smov 96   ;;  %s4008_s11 = smov 64  }
  0xe5   : > { %3314 = vmatpush3.bf16.msra.mxu1 %v3570_v21  ;;  %v3079_v50 = vld [vmem:[%s4961_s3] ss:$0 sm:$0xff]  ;;  %s4009_s20 = smov 32   ;;  %vm1943_vm4 = vcmask 523264   ;;  %vm1948_vm5 = vcmask 785408   ;;  %p3203_p2 = scmp.ne.s32.totalorder %s3981_s28, 1 }
  0xe6   : > { %936 = vmatpush1.bf16.msra.mxu0 %v3569_v20  ;;  %3315 = vmatprep.subr.bf16.mxu1 %v4004_v6 }
  0xe7   : > { %937 = vmatprep.subr.bf16.mxu0 %v3571_v22 }
  0xe9   : > { %3316 = vmatpush3.bf16.msra.mxu1 %v3574_v24 }
  0xea   : > { %938 = vmatpush1.bf16.msra.mxu0 %v3573_v23  ;;  %3317 = vmatprep.subr.bf16.mxu1 %v4004_v6 }
  0xeb   : > { %939 = vmatprep.subr.bf16.mxu0 %v3575_v25 }
  0xed   : > { %3318 = vmatpush3.bf16.msra.mxu1 %v3578_v27 }
  0xee   : > { %940 = vmatpush1.bf16.msra.mxu0 %v3577_v26  ;;  %3319 = vmatprep.subr.bf16.mxu1 %v4004_v6 }
  0xef   : > { %941 = vmatprep.subr.bf16.mxu0 %v3579_v28 }
  0xf1   : > { %3320 = vmatpush3.bf16.msra.mxu1 %v3582_v30 }
  0xf2   : > { %942 = vmatpush1.bf16.msra.mxu0 %v3581_v29  ;;  %3321 = vmatprep.subr.bf16.mxu1 %v4004_v6 }
  0xf3   : > { %943 = vmatprep.subr.bf16.mxu0 %v3583_v31 }
  0xf5   : > { %3322 = vmatpush3.bf16.msra.mxu1 %v3586_v34 }
  0xf6   : > { %944 = vmatpush1.bf16.msra.mxu0 %v3585_v33  ;;  %3323 = vmatprep.subr.bf16.mxu1 %v4004_v6 }
  0xf7   : > { %945 = vmatprep.subr.bf16.mxu0 %v3587_v35 }
  0xf9   : > { %3324 = vmatpush3.bf16.msra.mxu1 %v3590_v37 }
  0xfa   : > { %946 = vmatpush1.bf16.msra.mxu0 %v3589_v36  ;;  %3329 = vmatprep.subr.bf16.mxu1 %v4004_v6 }
  0xfb   : > { %3353 = vmatprep.subr.bf16.mxu0 %v4004_v6 }
 0x169   : > { %v732_v9 = vpop.xlane.xlu0 %731 }
 0x16a   : > { %v736_v10 = vmul.f32 0.0078125, %v732_v9 }
 0x16c   : > { %v4425_v11 = vsub.f32 %v727_v2, %v736_v10 }
 0x16d   : > { %v734_v12 = vpop.xlane.xlu0 %733 }
 0x16e   : > { %v737_v13 = vmul.f32 0.0078125, %v734_v12  ;;  %v740_v14 = vmul.f32 %v4425_v11, %v4425_v11 }
 0x170   : > { %v4429_v15 = vsub.f32 %v728_v3, %v737_v13  ;;  %742 = vadd.xlane.f32.xlu1 %v740_v14 }
 0x172   : > { %v741_v16 = vmul.f32 %v4429_v15, %v4429_v15 }
 0x174   : > { %744 = vadd.xlane.f32.xlu1 %v741_v16 }
 0x1fd   : > { %v743_v38 = vpop.xlane.xlu1 %742 }
 0x1fe   : > { %v746_v39 = vmul.f32 0.0078125, %v743_v38 }
 0x200   : > { %v748_v40 = vadd.f32 1e-05, %v746_v39 }
 0x201   : > { %v745_v41 = vpop.xlane.xlu1 %744 }
 0x202   : > { %3679 = vrsqrt.f32 %v748_v40  ;;  %v747_v42 = vmul.f32 0.0078125, %v745_v41 }
 0x204   : > { %v749_v43 = vadd.f32 1e-05, %v747_v42 }
 0x206   : > { %3681 = vrsqrt.f32 %v749_v43 }
 0x20c   : > { %v3680_v44 = vpop.eup %3679 }
 0x20d   : > { %v752_v45 = vmul.f32 %v3680_v44, %v4425_v11 }
 0x20f   : > { %v760_v49 = vmul.f32 %v3078_v46, %v752_v45 }
 0x210   : > { %v3682_v47 = vpop.eup %3681 }
 0x211   : > { %v753_v48 = vmul.f32 %v3682_v47, %v4429_v15  ;;  %v768_v52 = vadd.f32 %v3079_v50, %v760_v49 }
 0x213   : > { %v761_v51 = vmul.f32 %v3078_v46, %v753_v48 }
 0x215   : > { %v769_v53 = vadd.f32 %v3079_v50, %v761_v51 }
 0x217   : > { %v770_v54 = vpack.c.bf16 %v769_v53, %v768_v52 }
 0x219   : > { %964 = vmatmul.mubr.bf16.vlgmr.msra.gmra.mrb[0].mxu0 %v770_v54  ;;  %3326 = vmatmul.mubr.bf16.vlgmr.msra.gmra.mrb[0].mxu1 %v770_v54 }
 0x21a   : > { %3331 = vmatprep.mubr.msk.bf16.mxu1 %vm4006_vm0, %v4004_v6  ;;  %3355 = vmatprep.mubr.msk.bf16.mxu0 %vm4006_vm0, %v4004_v6 }
 0x2ec   : > { %v965_v55 = vpop.f32.mrb[0].mxu0  ;;  %v1008_v56 = vpop.f32.mrb[0].mxu1 }
 0x2ed   : > { %v967_v57 = vpop.f32.mrb[1].mxu0  ;;  %v3327_v58 = vpop.f32.mrb[1].mxu1  ;;  %v1015_v1 = vmul.f32 0.17677669, %v965_v55  ;;  %v4498_v7 = vpack.c.bf16 %v1008_v56, %v1008_v56 }
 0x2ee   : > { %v4480_v59 = vpack.c.bf16 %v967_v57, %v967_v57  ;;  %v969_v60 = vpop.f32.mrb[2].mxu0  ;;  %v4482_v61 = vpop.f32.mrb[2].mxu1 }
 0x2ef   : > { %v971_v62 = vpop.f32.mrb[3].mxu0  ;;  %v3328_v63 = vpop.f32.mrb[3].mxu1  ;;  %v4489_v3 = vpack.c.bf16 %v1015_v1, %v1015_v1  ;;  %v1016_v5 = vmul.f32 0.17677669, %v969_v60  ;;  %v1148_v9 = vsel %vm1146_vm2, %v4498_v7, 0  ;;  %v4525_v37 = vpack.c.bf16 %v4482_v61, %v4482_v61 }
 0x2f0   : > { %v1028_v0 = vsel %vm1023_vm1, %v4480_v59, 0  ;;  %v4487_v2 = vpack.c.bf16 %v971_v62, %v971_v62 }
 0x2f1   : > { %3330 = vmatpush3.bf16.xpose.msra.mxu1 %v1028_v0  ;;  %v4500_v8 = vpack.c.bf16 %v1016_v5, %v1016_v5  ;;  %v1194_v41 = vsel %vm1146_vm2, %v4525_v37, 0 }
 0x2f2   : > { %3335 = vmatprep.subr.bf16.mxu1 %v4004_v6  ;;  %v1074_v4 = vsel %vm1023_vm1, %v4487_v2, 0 }
 0x2f8   : > { %3332 = vmatmul.mubr.msk.bf16.vlgmr.msra.gmra.mrb[4].mxu1 %vm1023_vm1, %v4489_v3 }
 0x2f9   : > { %3336 = vmatpush3.bf16.xpose.msra.mxu1 %v1074_v4  ;;  %3337 = vmatprep.mubr.msk.bf16.mxu1 %vm4006_vm0, %v4004_v6 }
 0x2fa   : > { %3341 = vmatprep.subr.bf16.mxu1 %v4004_v6 }
 0x300   : > { %3338 = vmatmul.mubr.msk.bf16.vlgmr.msra.gmra.mrb[8].mxu1 %vm1023_vm1, %v4500_v8 }
 0x301   : > { %3342 = vmatpush3.bf16.msra.mxu1 %v1148_v9  ;;  %3343 = vmatprep.mubr.msk.bf16.mxu1 %vm4006_vm0, %v4004_v6 }
 0x302   : > { %3347 = vmatprep.subr.bf16.mxu1 %v4004_v6 }
 0x3cb   : > { %v1064_v10 = vpop.f32.mrb[4].mxu1 }
 0x3cc   : > { %v3333_v11 = vpop.f32.mrb[5].mxu1  ;;  %v1117_v12 = vsel %vm1116_vm3, %v1064_v10, -inf }
 0x3cd   : > { %1118 = vmax.xlane.f32.xlu0 %v1117_v12  ;;  %v1067_v13 = vpop.f32.mrb[6].mxu1 }
 0x3ce   : > { %v3334_v14 = vpop.f32.mrb[7].mxu1 }
 0x3d3   : > { %v1110_v15 = vpop.f32.mrb[8].mxu1 }
 0x3d4   : > { %v3339_v16 = vpop.f32.mrb[9].mxu1  ;;  %v1120_v17 = vsel %vm1116_vm3, %v1110_v15, -inf }
 0x3d5   : > { %1121 = vmax.xlane.f32.xlu1 %v1120_v17  ;;  %v1113_v18 = vpop.f32.mrb[10].mxu1 }
 0x3d6   : > { %v3340_v19 = vpop.f32.mrb[11].mxu1 }
 0x3e6   : > { %1294 = vrot.lane.b32.xlu1 %v4487_v2, %s4007_s18 }
 0x45a   : > { %v1119_v20 = vpop.xlane.xlu0 %1118 }
 0x45b   : > { %v1123_v21 = vsub.f32 %v1064_v10, %v1119_v20 }
 0x45d   : > { %v1125_v22 = vmul.f32 1.442695, %v1123_v21 }
 0x45f   : > { %3683 = vpow2.f32 %v1125_v22 }
 0x462   : > { %v1122_v23 = vpop.xlane.xlu1 %1121 }
 0x463   : > { %v1124_v24 = vsub.f32 %v1110_v15, %v1122_v23 }
 0x465   : > { %v1127_v25 = vmul.f32 1.442695, %v1124_v24 }
 0x466   : > { %v1295_v31 = vpop.permute.xlu1 %1294 }
 0x467   : > { %3685 = vpow2.f32 %v1127_v25  ;;  %v1300_v45 = vsel %vm1023_vm1, %v1295_v31, 0 }
 0x469   : > { %v3684_v26 = vpop.eup %3683 }
 0x46a   : > { %v1129_v27 = vsel %vm1116_vm3, %v3684_v26, 0.0 }
 0x46b   : > { %1130 = vadd.xlane.f32.xlu0 %v1129_v27 }
 0x471   : > { %v3686_v28 = vpop.eup %3685 }
 0x472   : > { %v1132_v29 = vsel %vm1116_vm3, %v3686_v28, 0.0 }
 0x473   : > { %1133 = vadd.xlane.f32.xlu1 %v1132_v29 }
 0x481   : > { %1242 = vrot.lane.b32.xlu0 %v4480_v59, %s4007_s18 }
 0x484   : > { %1239 = vrot.lane.b32.xlu1 %v4489_v3, %s4007_s18 }
 0x488   : > { %1291 = vrot.lane.b32.xlu1 %v4500_v8, %s4007_s18 }
 0x4f8   : > { %v1131_v30 = vpop.xlane.xlu0 %1130 }
 0x4f9   : > { %3687 = vrcp.f32 %v1131_v30 }
 0x4fc   : > { %v1243_v33 = vpop.permute.xlu0 %1242 }
 0x4fd   : > { %v1248_v34 = vsel %vm1023_vm1, %v1243_v33, 0 }
 0x4fe   : > { %3354 = vmatpush3.bf16.xpose.msra.mxu0 %v1248_v34 }
 0x4ff   : > { %3365 = vmatprep.subr.bf16.mxu0 %v4004_v6 }
 0x500   : > { %v1134_v35 = vpop.xlane.xlu1 %1133 }
 0x501   : > { %3689 = vrcp.f32 %v1134_v35 }
 0x503   : > { %v3688_v36 = vpop.eup %3687 }
 0x504   : > { %v1137_v38 = vmul.f32 %v3688_v36, %v3684_v26  ;;  %v1240_v39 = vpop.permute.xlu1 %1239 }
 0x505   : > { %3356 = vmatmul.mubr.msk.bf16.vlgmr.msra.gmra.mrb[4].mxu0 %vm1023_vm1, %v1240_v39 }
 0x506   : > { %1139 = vst.msk [vmem:[%s4416_s25] sm:$0xff] %vm1116_vm3, %v1137_v38  ;;  %v1141_v40 = vpack.c.bf16 %v1137_v38, %v1137_v38  ;;  %3367 = vmatprep.mubr.msk.bf16.mxu0 %vm4006_vm0, %v4004_v6 }
 0x508   : > { %3344 = vmatmul.mubr.msk.bf16.vlgmr.msra.gmra.mrb[12].mxu1 %vm1116_vm3, %v1141_v40  ;;  %v1292_v46 = vpop.permute.xlu1 %1291 }
 0x509   : > { %3348 = vmatpush3.bf16.msra.mxu1 %v1194_v41  ;;  %3349 = vmatprep.mubr.msk.bf16.mxu1 %vm4006_vm0, %v4004_v6 }
 0x50a   : > { %3359 = vmatprep.subr.bf16.mxu1 %v4004_v6 }
 0x50b   : > { %v3690_v42 = vpop.eup %3689 }
 0x50c   : > { %v1138_v43 = vmul.f32 %v3690_v42, %v3686_v28 }
 0x50e   : > { %1140 = vst.msk [vmem:[%s4416_s25 + $0x8] sm:$0xff] %vm1116_vm3, %v1138_v43  ;;  %v1142_v44 = vpack.c.bf16 %v1138_v43, %v1138_v43 }
 0x510   : > { %3350 = vmatmul.mubr.msk.bf16.vlgmr.msra.gmra.mrb[16].mxu1 %vm1116_vm3, %v1142_v44 }
 0x511   : > { %3361 = vmatprep.mubr.msk.bf16.mxu1 %vm4006_vm0, %v4004_v6 }
 0x512   : > { %3360 = vmatpush3.bf16.xpose.msra.mxu1 %v1300_v45 }
 0x513   : > { %3371 = vmatprep.subr.bf16.mxu1 %v4004_v6 }
 0x519   : > { %3362 = vmatmul.mubr.msk.bf16.vlgmr.msra.gmra.mrb[20].mxu1 %vm1023_vm1, %v1292_v46 }
 0x51a   : > { %3373 = vmatprep.mubr.msk.bf16.mxu1 %vm4006_vm0, %v4004_v6 }
 0x5d8   : > { %v1284_v47 = vpop.f32.mrb[4].mxu0 }
 0x5d9   : > { %v3357_v48 = vpop.f32.mrb[5].mxu0  ;;  %v1342_v49 = vsel %vm1116_vm3, %v1284_v47, -inf }
 0x5da   : > { %1343 = vmax.xlane.f32.xlu0 %v1342_v49  ;;  %v1287_v50 = vpop.f32.mrb[6].mxu0 }
 0x5db   : > { %v4549_v51 = vpop.f32.mrb[12].mxu1  ;;  %v3358_v52 = vpop.f32.mrb[7].mxu0 }
 0x5dc   : > { %v3345_v53 = vpop.f32.mrb[13].mxu1 }
 0x5dd   : > { %v1187_v54 = vpop.f32.mrb[14].mxu1 }
 0x5de   : > { %v3346_v55 = vpop.f32.mrb[15].mxu1 }
 0x5e3   : > { %v4551_v56 = vpop.f32.mrb[16].mxu1 }
 0x5e4   : > { %v3351_v57 = vpop.f32.mrb[17].mxu1 }
 0x5e5   : > { %v1233_v58 = vpop.f32.mrb[18].mxu1 }
 0x5e6   : > { %v3352_v60 = vpop.f32.mrb[19].mxu1 }
 0x5ec   : > { %v1336_v61 = vpop.f32.mrb[20].mxu1 }
 0x5ed   : > { %v3363_v62 = vpop.f32.mrb[21].mxu1  ;;  %v1345_v63 = vsel %vm1116_vm3, %v1336_v61, -inf }
 0x5ee   : > { %1346 = vmax.xlane.f32.xlu1 %v1345_v63  ;;  %v1339_v0 = vpop.f32.mrb[22].mxu1 }
 0x5ef   : > { %v3364_v1 = vpop.f32.mrb[23].mxu1 }
 0x5ff   : > { %1419 = vrot.lane.b32.xlu1 %v4525_v37, %s4007_s18 }
 0x603   : > { %1471 = vrot.lane.b32.xlu1 %v4480_v59, %s4008_s11 }
 0x607   : > { %1521 = vrot.lane.b32.xlu1 %v4487_v2, %s4008_s11 }
 0x60b   : > { %1519 = vrot.lane.b32.xlu1 %v4500_v8, %s4008_s11 }
 0x667   : > { %v1344_v4 = vpop.xlane.xlu0 %1343 }
 0x668   : > { %v1348_v5 = vsub.f32 %v1284_v47, %v1344_v4 }
 0x66a   : > { %v1350_v9 = vmul.f32 1.442695, %v1348_v5 }
 0x66c   : > { %3691 = vpow2.f32 %v1350_v9 }
 0x676   : > { %v3692_v10 = vpop.eup %3691 }
 0x677   : > { %v1354_v11 = vsel %vm1116_vm3, %v3692_v10, 0.0 }
 0x678   : > { %1355 = vadd.xlane.f32.xlu0 %v1354_v11 }
 0x67b   : > { %v1347_v12 = vpop.xlane.xlu1 %1346 }
 0x67c   : > { %v1349_v13 = vsub.f32 %v1336_v61, %v1347_v12 }
 0x67e   : > { %v1352_v14 = vmul.f32 1.442695, %v1349_v13 }
 0x67f   : > { %v1420_v15 = vpop.permute.xlu1 %1419 }
 0x680   : > { %3693 = vpow2.f32 %v1352_v14  ;;  %v1425_v16 = vsel %vm1146_vm2, %v1420_v15, 0 }
 0x681   : > { %3372 = vmatpush3.bf16.msra.mxu1 %v1425_v16 }
 0x682   : > { %3383 = vmatprep.subr.bf16.mxu1 %v4004_v6 }
 0x683   : > { %v1472_v25 = vpop.permute.xlu1 %1471 }
 0x684   : > { %v1477_v30 = vsel %vm1023_vm1, %v1472_v25, 0 }
 0x687   : > { %v1522_v29 = vpop.permute.xlu1 %1521 }
 0x688   : > { %v1527_v33 = vsel %vm1023_vm1, %v1522_v29, 0 }
 0x68a   : > { %v3694_v17 = vpop.eup %3693 }
 0x68b   : > { %v1357_v18 = vsel %vm1116_vm3, %v3694_v17, 0.0  ;;  %v1520_v35 = vpop.permute.xlu1 %1519 }
 0x68c   : > { %1358 = vadd.xlane.f32.xlu0 %v1357_v18 }
 0x6a2   : > { %1370 = vrot.lane.b32.xlu0 %v4498_v7, %s4007_s18 }
 0x6a6   : > { %1469 = vrot.lane.b32.xlu0 %v4489_v3, %s4008_s11 }
 0x705   : > { %v1356_v19 = vpop.xlane.xlu0 %1355 }
 0x706   : > { %3695 = vrcp.f32 %v1356_v19 }
 0x710   : > { %v3696_v20 = vpop.eup %3695 }
 0x711   : > { %v1362_v21 = vmul.f32 %v3696_v20, %v3692_v10 }
 0x713   : > { %3110 = vst.msk [vmem:[%s4416_s25 + $0x10] sm:$0xff] %vm1116_vm3, %v1362_v21  ;;  %v1367_v26 = vpack.c.bf16 %v1362_v21, %v1362_v21 }
 0x719   : > { %v1359_v22 = vpop.xlane.xlu0 %1358 }
 0x71a   : > { %3697 = vrcp.f32 %v1359_v22 }
 0x71d   : > { %v1371_v23 = vpop.permute.xlu0 %1370 }
 0x71e   : > { %v1376_v24 = vsel %vm1146_vm2, %v1371_v23, 0 }
 0x71f   : > { %3366 = vmatpush3.bf16.msra.mxu0 %v1376_v24 }
 0x720   : > { %3377 = vmatprep.subr.bf16.mxu0 %v4004_v6 }
 0x721   : > { %v1470_v34 = vpop.permute.xlu0 %1469 }
 0x722   : > { %3368 = vmatmul.mubr.msk.bf16.vlgmr.msra.gmra.mrb[8].mxu0 %vm1116_vm3, %v1367_v26 }
 0x723   : > { %3379 = vmatprep.mubr.msk.bf16.mxu0 %vm4006_vm0, %v4004_v6 }
 0x724   : > { %v3698_v27 = vpop.eup %3697 }
 0x725   : > { %v1363_v28 = vmul.f32 %v3698_v27, %v3694_v17 }
 0x727   : > { %3111 = vst.msk [vmem:[%s4416_s25 + $0x18] sm:$0xff] %vm1116_vm3, %v1363_v28  ;;  %v1368_v31 = vpack.c.bf16 %v1363_v28, %v1363_v28 }
 0x728   : > { %3378 = vmatpush3.bf16.xpose.msra.mxu0 %v1477_v30 }
 0x729   : > { %3374 = vmatmul.mubr.msk.bf16.vlgmr.msra.gmra.mrb[24].mxu1 %vm1116_vm3, %v1368_v31  ;;  %3389 = vmatprep.subr.bf16.mxu0 %v4004_v6 }
 0x72a   : > { %3384 = vmatpush3.bf16.xpose.msra.mxu1 %v1527_v33  ;;  %3385 = vmatprep.mubr.msk.bf16.mxu1 %vm4006_vm0, %v4004_v6 }
 0x72b   : > { %3395 = vmatprep.subr.bf16.mxu1 %v4004_v6 }
 0x72f   : > { %3380 = vmatmul.mubr.msk.bf16.vlgmr.msra.gmra.mrb[12].mxu0 %vm1023_vm1, %v1470_v34 }
 0x730   : > { %3391 = vmatprep.mubr.msk.bf16.mxu0 %vm4006_vm0, %v4004_v6 }
 0x731   : > { %3386 = vmatmul.mubr.msk.bf16.vlgmr.msra.gmra.mrb[28].mxu1 %vm1023_vm1, %v1520_v35 }
 0x732   : > { %3397 = vmatprep.mubr.msk.bf16.mxu1 %vm4006_vm0, %v4004_v6 }
 0x7f5   : > { %v4592_v36 = vpop.f32.mrb[8].mxu0 }
 0x7f6   : > { %v3369_v38 = vpop.f32.mrb[9].mxu0 }
 0x7f7   : > { %v1415_v39 = vpop.f32.mrb[10].mxu0 }
 0x7f8   : > { %v3370_v40 = vpop.f32.mrb[11].mxu0 }
 0x7fc   : > { %v4594_v41 = vpop.f32.mrb[24].mxu1 }
 0x7fd   : > { %v3375_v42 = vpop.f32.mrb[25].mxu1 }
 0x7fe   : > { %v1464_v43 = vpop.f32.mrb[26].mxu1 }
 0x7ff   : > { %v3376_v44 = vpop.f32.mrb[27].mxu1 }
 0x802   : > { %v1513_v45 = vpop.f32.mrb[12].mxu0 }
 0x803   : > { %v3381_v46 = vpop.f32.mrb[13].mxu0  ;;  %v1569_v47 = vsel %vm1116_vm3, %v1513_v45, -inf }
 0x804   : > { %1570 = vmax.xlane.f32.xlu0 %v1569_v47  ;;  %v1516_v48 = vpop.f32.mrb[14].mxu0  ;;  %v1563_v49 = vpop.f32.mrb[28].mxu1  ;;  %v1468_v46 = vpack.c.bf16 %v4594_v41, %v4594_v41 }
 0x805   : > { %v3382_v50 = vpop.f32.mrb[15].mxu0  ;;  %v3387_v52 = vpop.f32.mrb[29].mxu1  ;;  %v1572_v53 = vsel %vm1116_vm3, %v1563_v49, -inf }
 0x806   : > { %1573 = vmax.xlane.f32.xlu1 %v1572_v53  ;;  %v1566_v54 = vpop.f32.mrb[30].mxu1 }
 0x807   : > { %v3388_v55 = vpop.f32.mrb[31].mxu1 }
 0x817   : > { %1644 = vrot.lane.b32.xlu1 %v4525_v37, %s4008_s11 }
 0x81b   : > { %1696 = vrot.lane.b32.xlu1 %v4480_v59, %s4009_s20 }
 0x81f   : > { %1746 = vrot.lane.b32.xlu1 %v4487_v2, %s4009_s20 }
 0x823   : > { %1744 = vrot.lane.b32.xlu1 %v4500_v8, %s4009_s20 }
 0x891   : > { %v1571_v57 = vpop.xlane.xlu0 %1570 }
 0x892   : > { %v1575_v58 = vsub.f32 %v1513_v45, %v1571_v57  ;;  %v1467_v45 = vpack.c.bf16 %v4592_v36, %v4592_v36 }
 0x893   : > { %v1574_v60 = vpop.xlane.xlu1 %1573 }
 0x894   : > { %v1577_v61 = vmul.f32 1.442695, %v1575_v58  ;;  %v1576_v62 = vsub.f32 %v1563_v49, %v1574_v60 }
 0x896   : > { %3699 = vpow2.f32 %v1577_v61  ;;  %v1579_v63 = vmul.f32 1.442695, %v1576_v62 }
 0x897   : > { %v1645_v0 = vpop.permute.xlu1 %1644 }
 0x898   : > { %3701 = vpow2.f32 %v1579_v63  ;;  %v1650_v1 = vsel %vm1146_vm2, %v1645_v0, 0 }
 0x899   : > { %3396 = vmatpush3.bf16.msra.mxu1 %v1650_v1 }
 0x89a   : > { %3407 = vmatprep.subr.bf16.mxu1 %v4004_v6 }
 0x89b   : > { %v1697_v13 = vpop.permute.xlu1 %1696 }
 0x89c   : > { %v1702_v18 = vsel %vm1023_vm1, %v1697_v13, 0  ;;  %v3596_v13 = vld [vmem:[%s4372_s24 + $0x28] sm:$0xff]  }
 0x8a0   : > { %v3700_v59 = vpop.eup %3699 }
 0x8a1   : > { %v1581_v2 = vsel %vm1116_vm3, %v3700_v59, 0.0 }
 0x8a2   : > { %v3702_v4 = vpop.eup %3701  ;;  %1582 = vadd.xlane.f32.xlu0 %v1581_v2 }
 0x8a3   : > { %v1584_v8 = vsel %vm1116_vm3, %v3702_v4, 0.0 }
 0x8a6   : > { %1585 = vadd.xlane.f32.xlu0 %v1584_v8 }
 0x8bc   : > { %1596 = vrot.lane.b32.xlu0 %v4498_v7, %s4008_s11 }
 0x8c0   : > { %1694 = vrot.lane.b32.xlu0 %v4489_v3, %s4009_s20  ;;  %v1747_v3 = vpop.permute.xlu1 %1746 }
 0x8c1   : > { %v1752_v20 = vsel %vm1023_vm1, %v1747_v3, 0 }
 0x8c4   : > { %v1745_v22 = vpop.permute.xlu1 %1744 }
 0x92f   : > { %v1583_v5 = vpop.xlane.xlu0 %1582 }
 0x930   : > { %3703 = vrcp.f32 %v1583_v5  ;;  %v3591_v5 = vld [vmem:[%s4372_s24] sm:$0xff]  }
 0x933   : > { %v1586_v9 = vpop.xlane.xlu0 %1585 }
 0x934   : > { %3705 = vrcp.f32 %v1586_v9  ;;  %v3592_v9 = vld [vmem:[%s4372_s24 + $0x8] sm:$0xff]  }
 0x937   : > { %v1597_v10 = vpop.permute.xlu0 %1596 }
 0x938   : > { %v1602_v11 = vsel %vm1146_vm2, %v1597_v10, 0  ;;  %v3593_v10 = vld [vmem:[%s4372_s24 + $0x10] sm:$0xff]  }
 0x939   : > { %3390 = vmatpush3.bf16.msra.mxu0 %v1602_v11  ;;  %v3594_v11 = vld [vmem:[%s4372_s24 + $0x18] sm:$0xff]  }
 0x93a   : > { %v3704_v12 = vpop.eup %3703  ;;  %3401 = vmatprep.subr.bf16.mxu0 %v4004_v6 }
 0x93b   : > { %v1589_v14 = vmul.f32 %v3704_v12, %v3700_v59  ;;  %v1695_v21 = vpop.permute.xlu0 %1694  ;;  %v3595_v12 = vld [vmem:[%s4372_s24 + $0x20] sm:$0xff]  }
 0x93d   : > { %3116 = vst.msk [vmem:[%s4416_s25 + $0x20] sm:$0xff] %vm1116_vm3, %v1589_v14  ;;  %v1594_v15 = vpack.c.bf16 %v1589_v14, %v1589_v14  ;;  %v3597_v14 = vld [vmem:[%s4372_s24 + $0x30] sm:$0xff]  }
 0x93e   : > { %v3706_v16 = vpop.eup %3705 }
 0x93f   : > { %v1590_v17 = vmul.f32 %v3706_v16, %v3702_v4  ;;  %3392 = vmatmul.mubr.msk.bf16.vlgmr.msra.gmra.mrb[16].mxu0 %vm1116_vm3, %v1594_v15  ;;  %v3598_v15 = vld [vmem:[%s4372_s24 + $0x38] sm:$0xff]  }
 0x940   : > { %3403 = vmatprep.mubr.msk.bf16.mxu0 %vm4006_vm0, %v4004_v6 }
 0x941   : > { %3117 = vst.msk [vmem:[%s4416_s25 + $0x28] sm:$0xff] %vm1116_vm3, %v1590_v17  ;;  %v1595_v19 = vpack.c.bf16 %v1590_v17, %v1590_v17 }
 0x942   : > { %3402 = vmatpush3.bf16.xpose.msra.mxu0 %v1702_v18 }
 0x943   : > { %3398 = vmatmul.mubr.msk.bf16.vlgmr.msra.gmra.mrb[32].mxu1 %vm1116_vm3, %v1595_v19  ;;  %3413 = vmatprep.subr.bf16.mxu0 %v4004_v6 }
 0x944   : > { %3408 = vmatpush3.bf16.xpose.msra.mxu1 %v1752_v20  ;;  %3409 = vmatprep.mubr.msk.bf16.mxu1 %vm4006_vm0, %v4004_v6 }
 0x945   : > { %3419 = vmatprep.subr.bf16.mxu1 %v4004_v6 }
 0x949   : > { %3404 = vmatmul.mubr.msk.bf16.vlgmr.msra.gmra.mrb[20].mxu0 %vm1023_vm1, %v1695_v21 }
 0x94a   : > { %3415 = vmatprep.mubr.msk.bf16.mxu0 %vm4006_vm0, %v4004_v6 }
 0x94b   : > { %3410 = vmatmul.mubr.msk.bf16.vlgmr.msra.gmra.mrb[36].mxu1 %vm1023_vm1, %v1745_v22 }
 0x94c   : > { %3421 = vmatprep.mubr.msk.bf16.mxu1 %vm4006_vm0, %v4004_v6 }
 0xa12   : > { %v1638_v23 = vpop.f32.mrb[16].mxu0 }
 0xa13   : > { %v3393_v24 = vpop.f32.mrb[17].mxu0  ;;  %v1692_v60 = vpack.c.bf16 %v1638_v23, %v1638_v23 }
 0xa14   : > { %v1641_v25 = vpop.f32.mrb[18].mxu0 }
 0xa15   : > { %v3394_v26 = vpop.f32.mrb[19].mxu0 }
 0xa16   : > { %v1686_v27 = vpop.f32.mrb[32].mxu1 }
 0xa17   : > { %v3399_v28 = vpop.f32.mrb[33].mxu1  ;;  %v1693_v47 = vpack.c.bf16 %v1686_v27, %v1686_v27 }
 0xa18   : > { %v1689_v29 = vpop.f32.mrb[34].mxu1  ;;  %v1236_v28 = vpack.c.bf16 %v4549_v51, %v4549_v51  ;;  %v3126_v51 = vld [vmem:[%s702_s30] ss:$0 sm:$0xff] }
 0xa19   : > { %v3400_v30 = vpop.f32.mrb[35].mxu1  ;;  %v1237_v29 = vpack.c.bf16 %v4551_v56, %v4551_v56 }
 0xa1c   : > { %v1738_v31 = vpop.f32.mrb[20].mxu0 }
 0xa1d   : > { %v3405_v33 = vpop.f32.mrb[21].mxu0  ;;  %v1794_v34 = vsel %vm1116_vm3, %v1738_v31, -inf }
 0xa1e   : > { %1795 = vmax.xlane.f32.xlu0 %v1794_v34  ;;  %v1741_v35 = vpop.f32.mrb[22].mxu0  ;;  %v1788_v38 = vpop.f32.mrb[36].mxu1 }
 0xa1f   : > { %v3406_v39 = vpop.f32.mrb[23].mxu0  ;;  %v3411_v40 = vpop.f32.mrb[37].mxu1  ;;  %v1797_v42 = vsel %vm1116_vm3, %v1788_v38, -inf }
 0xa20   : > { %1798 = vmax.xlane.f32.xlu1 %v1797_v42  ;;  %v1791_v43 = vpop.f32.mrb[38].mxu1 }
 0xa21   : > { %v3412_v44 = vpop.f32.mrb[39].mxu1 }
 0xa31   : > { %1869 = vrot.lane.b32.xlu1 %v4525_v37, %s4009_s20 }
 0xa35   : > { %1921 = vrot.lane.b32.xlu1 %v1467_v45, %s4009_s20 }
 0xa39   : > { %1923 = vrot.lane.b32.xlu1 %v1468_v46, %s4009_s20 }
 0xa3d   : > { %1929 = vrot.lane.b32.xlu1 %v1693_v47, %s4008_s11 }
 0xaab   : > { %v1796_v48 = vpop.xlane.xlu0 %1795 }
 0xaac   : > { %v1800_v49 = vsub.f32 %v1738_v31, %v1796_v48  ;;  %v3719_v48 = vld [vmem:[#allocation2] sm:$0xff] }
 0xaad   : > { %v1799_v50 = vpop.xlane.xlu1 %1798 }
 0xaae   : > { %v1802_v52 = vmul.f32 1.442695, %v1800_v49  ;;  %v1801_v53 = vsub.f32 %v1788_v38, %v1799_v50 }
 0xab0   : > { %3707 = vpow2.f32 %v1802_v52  ;;  %v1804_v37 = vmul.f32 1.442695, %v1801_v53  ;;  %v3599_v52 = vld [vmem:[%s4374_s16] ss:$16 sps:$4 sm:$0xff]   ;;  %v3601_v53 = vld [vmem:[%s4374_s16 + $0x4] ss:$16 sps:$4 sm:$0xff]  }
 0xab1   : > { %v1870_v54 = vpop.permute.xlu1 %1869 }
 0xab2   : > { %3709 = vpow2.f32 %v1804_v37  ;;  %v1875_v36 = vsel %vm1146_vm2, %v1870_v54, 0  ;;  %v3602_v37 = vld [vmem:[%s4374_s16 + $0x8] ss:$16 sps:$4 sm:$0xff]   ;;  %v3604_v54 = vld [vmem:[%s4374_s16 + $0xc] ss:$16 sps:$4 sm:$0xff]  }
 0xab3   : > { %3420 = vmatpush3.bf16.msra.mxu1 %v1875_v36  ;;  %v3607_v36 = vld [vmem:[%s4374_s16 + $0x24] ss:$16 sps:$4 sm:$0xff]  }
 0xab4   : > { %2328 = vmatprep.subr.bf16.mxu1 %v3601_v53  ;;  %v3655_v53 = vld [vmem:[%s4414_s22 + $0x50] sm:$0xff]  }
 0xab5   : > { %v1922_v25 = vpop.permute.xlu1 %1921 }
 0xab6   : > { %v1939_v31 = vsel %vm1023_vm1, %v1236_v28, %v1922_v25  ;;  %v3641_v25 = vld [vmem:[%s4374_s16 + $0xe0] ss:$16 sps:$4 sm:$0xff]  }
 0xab9   : > { %v1924_v26 = vpop.permute.xlu1 %1923 }
 0xaba   : > { %v3708_v55 = vpop.eup %3707  ;;  %v1942_v33 = vsel %vm1023_vm1, %v1237_v29, %v1924_v26  ;;  %v3644_v26 = vld [vmem:[%s4374_s16 + $0xe8] ss:$16 sps:$4 sm:$0xff]  }
 0xabb   : > { %v1806_v41 = vsel %vm1116_vm3, %v3708_v55, 0.0 }
 0xabc   : > { %v3710_v57 = vpop.eup %3709  ;;  %1807 = vadd.xlane.f32.xlu0 %v1806_v41  ;;  %v3605_v41 = vld [vmem:[%s4374_s16 + $0x20] ss:$16 sps:$4 sm:$0xff]  }
 0xabd   : > { %v1809_v58 = vsel %vm1116_vm3, %v3710_v57, 0.0 }
 0xac0   : > { %1810 = vadd.xlane.f32.xlu0 %v1809_v58 }
 0xad6   : > { %1821 = vrot.lane.b32.xlu0 %v4498_v7, %s4009_s20 }
 0xada   : > { %1927 = vrot.lane.b32.xlu0 %v1692_v60, %s4008_s11 }
 0xb49   : > { %v1808_v61 = vpop.xlane.xlu0 %1807 }
 0xb4a   : > { %3711 = vrcp.f32 %v1808_v61 }
 0xb4d   : > { %v1811_v62 = vpop.xlane.xlu0 %1810 }
 0xb4e   : > { %3713 = vrcp.f32 %v1811_v62 }
 0xb51   : > { %v1822_v63 = vpop.permute.xlu0 %1821 }
 0xb52   : > { %v1827_v0 = vsel %vm1146_vm2, %v1822_v63, 0 }
 0xb53   : > { %3414 = vmatpush3.bf16.msra.mxu0 %v1827_v0 }
 0xb54   : > { %v3712_v1 = vpop.eup %3711  ;;  %3425 = vmatprep.subr.bf16.mxu0 %v4004_v6 }
 0xb55   : > { %v1814_v59 = vmul.f32 %v3712_v1, %v3708_v55  ;;  %v1928_v27 = vpop.permute.xlu0 %1927  ;;  %v3610_v55 = vld [vmem:[%s4374_s16 + $0x2c] ss:$16 sps:$4 sm:$0xff]  }
 0xb56   : > { %v1945_v35 = vsel %vm1943_vm4, %v1939_v31, %v1928_v27  ;;  %v3647_v27 = vld [vmem:[%s4414_s22 + $0x40] sm:$0xff]  }
 0xb57   : > { %3122 = vst.msk [vmem:[%s4416_s25 + $0x30] sm:$0xff] %vm1116_vm3, %v1814_v59  ;;  %v1819_v7 = vpack.c.bf16 %v1814_v59, %v1814_v59 }
 0xb58   : > { %v3714_v2 = vpop.eup %3713 }
 0xb59   : > { %v1815_v4 = vmul.f32 %v3714_v2, %v3710_v57  ;;  %3416 = vmatmul.mubr.msk.bf16.vlgmr.msra.gmra.mrb[24].mxu0 %vm1116_vm3, %v1819_v7  ;;  %v3608_v57 = vld [vmem:[%s4374_s16 + $0x28] ss:$16 sps:$4 sm:$0xff]   ;;  %v3613_v7 = vld [vmem:[%s4374_s16 + $0x44] ss:$16 sps:$4 sm:$0xff]   ;;  %v3616_v2 = vld [vmem:[%s4374_s16 + $0x4c] ss:$16 sps:$4 sm:$0xff]  }
 0xb5a   : > { %3441 = vmatprep.mubr.msk.bf16.mxu0 %vm4006_vm0, %v4004_v6  ;;  %3426 = vmatpush3.bf16.msra.mxu0 %v3591_v5  ;;  %v3619_v5 = vld [vmem:[%s4374_s16 + $0x64] ss:$16 sps:$4 sm:$0xff]  }
 0xb5b   : > { %3123 = vst.msk [vmem:[%s4416_s25 + $0x38] sm:$0xff] %vm1116_vm3, %v1815_v4  ;;  %v1820_v8 = vpack.c.bf16 %v1815_v4, %v1815_v4  ;;  %3427 = vmatprep.subr.bf16.mxu0 %v4004_v6  ;;  %v3611_v4 = vld [vmem:[%s4374_s16 + $0x40] ss:$16 sps:$4 sm:$0xff]  }
 0xb5d   : > { %3422 = vmatmul.mubr.msk.bf16.vlgmr.msra.gmra.mrb[40].mxu1 %vm1116_vm3, %v1820_v8  ;;  %v3614_v8 = vld [vmem:[%s4374_s16 + $0x48] ss:$16 sps:$4 sm:$0xff]  }
 0xb5e   : > { %2360 = vmatprep.mubr.bf16.mxu1 %v4005_v32  ;;  %3428 = vmatpush3.bf16.msra.mxu0 %v3592_v9  ;;  %v3622_v9 = vld [vmem:[%s4374_s16 + $0x6c] ss:$16 sps:$4 sm:$0xff]  }
 0xb5f   : > { %3429 = vmatprep.subr.bf16.mxu0 %v4004_v6  ;;  %2329 = vmatpush1.bf16.msra.mxu1 %v3599_v52  ;;  %v3654_v52 = vld [vmem:[%s4414_s22 + $0x88] sm:$0xff]  }
 0xb60   : > { %2330 = vmatprep.subr.bf16.mxu1 %v3607_v36  ;;  %v3658_v36 = vld [vmem:[%s4414_s22 + $0x90] sm:$0xff]  }
 0xb62   : > { %3430 = vmatpush3.bf16.msra.mxu0 %v3593_v10  ;;  %v3617_v10 = vld [vmem:[%s4374_s16 + $0x60] ss:$16 sps:$4 sm:$0xff]  }
 0xb63   : > { %3431 = vmatprep.subr.bf16.mxu0 %v4004_v6  ;;  %2331 = vmatpush1.bf16.msra.mxu1 %v3605_v41  ;;  %v3660_v41 = vld [vmem:[%s4414_s22 + $0xd8] sm:$0xff]  }
 0xb64   : > { %2332 = vmatprep.subr.bf16.mxu1 %v3613_v7  ;;  %v3670_v7 = vld [vmem:[%s4414_s22 + $0xa8] sm:$0xff]  }
 0xb66   : > { %3432 = vmatpush3.bf16.msra.mxu0 %v3594_v11  ;;  %v3620_v11 = vld [vmem:[%s4374_s16 + $0x68] ss:$16 sps:$4 sm:$0xff]  }
 0xb67   : > { %3433 = vmatprep.subr.bf16.mxu0 %v4004_v6  ;;  %2333 = vmatpush1.bf16.msra.mxu1 %v3611_v4  ;;  %v3672_v4 = vld [vmem:[%s4414_s22 + $0xf0] sm:$0xff]  }
 0xb68   : > { %2334 = vmatprep.subr.bf16.mxu1 %v3619_v5  ;;  %v3674_v5 = vld [vmem:[%s4414_s22 + $0xb0] sm:$0xff]  }
 0xb6a   : > { %3434 = vmatpush3.bf16.msra.mxu0 %v3595_v12  ;;  %v3625_v12 = vld [vmem:[%s4374_s16 + $0x84] ss:$16 sps:$4 sm:$0xff]  }
 0xb6b   : > { %3435 = vmatprep.subr.bf16.mxu0 %v4004_v6  ;;  %2335 = vmatpush1.bf16.msra.mxu1 %v3617_v10  ;;  %v3676_v10 = vld [vmem:[%s4414_s22 + $0xf8] sm:$0xff]  }
 0xb6c   : > { %2336 = vmatprep.subr.bf16.mxu1 %v3625_v12  ;;  %v3678_v12 = vld [vmem:[%s4414_s22 + $0xb8] sm:$0xff]  }
 0xb6e   : > { %3436 = vmatpush3.bf16.msra.mxu0 %v3596_v13  ;;  %v3628_v13 = vld [vmem:[%s4374_s16 + $0x8c] ss:$16 sps:$4 sm:$0xff]  }
 0xb6f   : > { %3437 = vmatprep.subr.bf16.mxu0 %v4004_v6 }
 0xb72   : > { %3438 = vmatpush3.bf16.msra.mxu0 %v3597_v14  ;;  %v3623_v14 = vld [vmem:[%s4374_s16 + $0x80] ss:$16 sps:$4 sm:$0xff]  }
 0xb73   : > { %3439 = vmatprep.subr.bf16.mxu0 %v4004_v6  ;;  %v1930_v6 = vpop.permute.xlu1 %1929  ;;  %2337 = vmatpush1.bf16.msra.mxu1 %v3623_v14 }
 0xb74   : > { %v1947_v34 = vsel %vm1943_vm4, %v1942_v33, %v1930_v6  ;;  %v3648_v6 = vld [vmem:[%s4414_s22 + $0xc0] sm:$0xff]  }
 0xb76   : > { %3440 = vmatpush3.bf16.msra.mxu0 %v3598_v15  ;;  %v3626_v15 = vld [vmem:[%s4374_s16 + $0x88] ss:$16 sps:$4 sm:$0xff]  }
 0xb77   : > { %2371 = vmatprep.subr.bf16.mxu0 %v3604_v54  ;;  %v3657_v54 = vld [vmem:[%s4414_s22 + $0x10] sm:$0xff]  }
 0xc2c   : > { %v1863_v16 = vpop.f32.mrb[24].mxu0 }
 0xc2d   : > { %v1917_v17 = vpack.c.bf16 %v1863_v16, %v1863_v16  ;;  %v3417_v3 = vpop.f32.mrb[25].mxu0  ;;  %v3631_v16 = vld [vmem:[%s4374_s16 + $0xa4] ss:$16 sps:$4 sm:$0xff]  }
 0xc2e   : > { %v1866_v18 = vpop.f32.mrb[26].mxu0  ;;  %v3629_v3 = vld [vmem:[%s4374_s16 + $0xa0] ss:$16 sps:$4 sm:$0xff]   ;;  %2338 = vmatprep.subr.bf16.mxu1 %v3631_v16 }
 0xc2f   : > { %1933 = vrot.lane.b32.xlu0 %v1917_v17, %s4007_s18  ;;  %v3418_v19 = vpop.f32.mrb[27].mxu0  ;;  %v3634_v17 = vld [vmem:[%s4374_s16 + $0xac] ss:$16 sps:$4 sm:$0xff]   ;;  %v3632_v18 = vld [vmem:[%s4374_s16 + $0xa8] ss:$16 sps:$4 sm:$0xff]   ;;  %2339 = vmatpush1.bf16.msra.mxu1 %v3629_v3 }
 0xc30   : > { %v1911_v20 = vpop.f32.mrb[40].mxu1  ;;  %v3637_v19 = vld [vmem:[%s4374_s16 + $0xc4] ss:$16 sps:$4 sm:$0xff]  }
 0xc31   : > { %v1918_v21 = vpack.c.bf16 %v1911_v20, %v1911_v20  ;;  %v3423_v22 = vpop.f32.mrb[41].mxu1  ;;  %v3640_v20 = vld [vmem:[%s4374_s16 + $0xcc] ss:$16 sps:$4 sm:$0xff]   ;;  %2340 = vmatprep.subr.bf16.mxu1 %v3637_v19 }
 0xc32   : > { %v1914_v23 = vpop.f32.mrb[42].mxu1  ;;  %v3638_v22 = vld [vmem:[%s4374_s16 + $0xc8] ss:$16 sps:$4 sm:$0xff]  }
 0xc33   : > { %1935 = vrot.lane.b32.xlu1 %v1918_v21, %s4007_s18  ;;  %v3424_v24 = vpop.f32.mrb[43].mxu1  ;;  %v3635_v21 = vld [vmem:[%s4374_s16 + $0xc0] ss:$16 sps:$4 sm:$0xff]   ;;  %v3643_v23 = vld [vmem:[%s4374_s16 + $0xe4] ss:$16 sps:$4 sm:$0xff]  }
 0xc34   : > { %v3646_v24 = vld [vmem:[%s4374_s16 + $0xec] ss:$16 sps:$4 sm:$0xff]   ;;  %2341 = vmatpush1.bf16.msra.mxu1 %v3635_v21 }
 0xc35   : > { %2342 = vmatprep.subr.bf16.mxu1 %v3643_v23 }
 0xc38   : > { %2343 = vmatpush1.bf16.msra.mxu1 %v3641_v25 }
 0xc39   : > { %3265 = vmatprep.subr.bf16.mxu1 %v3647_v27 }
 0xca1   : > { %v1934_v30 = vpop.permute.xlu0 %1933 }
 0xca2   : > { %v1950_v39 = vsel %vm1948_vm5, %v1945_v35, %v1934_v30 }
 0xca5   : > { %v1936_v38 = vpop.permute.xlu1 %1935 }
 0xca6   : > { %v1952_v40 = vsel %vm1948_vm5, %v1947_v34, %v1936_v38 }
 0xca7   : > { %v3127_v42 = vcombine.low %v1950_v39, %v1952_v40  ;;  %v3136_v39 = vld [vmem:[%s705_s23] ss:$0 sm:$0xff] }
 0xca9   : > { %3442 = vmatmul.mubr.bf16.vlgmr.msra.gmra.mrb[28].mxu0 %v3127_v42 }
 0xcaa   : > { %2403 = vmatprep.mubr.bf16.mxu0 %v4005_v32  ;;  %v3720_v32 = vld [vmem:[#allocation2 + $0x8] sm:$0xff]  ;;  %2372 = vmatpush1.bf16.msra.mxu0 %v3602_v37  ;;  %v3656_v37 = vld [vmem:[%s4414_s22 + $0xd0] sm:$0xff]  }
 0xcab   : > { %2373 = vmatprep.subr.bf16.mxu0 %v3610_v55  ;;  %v3659_v55 = vld [vmem:[%s4414_s22 + $0x58] sm:$0xff]  }
 0xcae   : > { %2374 = vmatpush1.bf16.msra.mxu0 %v3608_v57  ;;  %v3661_v57 = vld [vmem:[%s4414_s22 + $0x18] sm:$0xff]  }
 0xcaf   : > { %2375 = vmatprep.subr.bf16.mxu0 %v3616_v2  ;;  %v3671_v2 = vld [vmem:[%s4414_s22 + $0x70] sm:$0xff]  }
 0xcb2   : > { %2376 = vmatpush1.bf16.msra.mxu0 %v3614_v8  ;;  %v3673_v8 = vld [vmem:[%s4414_s22 + $0x30] sm:$0xff]  }
 0xcb3   : > { %2377 = vmatprep.subr.bf16.mxu0 %v3622_v9  ;;  %v3675_v9 = vld [vmem:[%s4414_s22 + $0x78] sm:$0xff]  }
 0xcb6   : > { %2378 = vmatpush1.bf16.msra.mxu0 %v3620_v11  ;;  %v3677_v11 = vld [vmem:[%s4414_s22 + $0x38] sm:$0xff]  }
 0xcb7   : > { %2379 = vmatprep.subr.bf16.mxu0 %v3628_v13  ;;  %v2148_v13 = vlaneseq }
 0xcb9   : > { %v2149_v14 = vshrl.u32 %v2148_v13, 7 }
 0xcba   : > { %2380 = vmatpush1.bf16.msra.mxu0 %v3626_v15 }
 0xcbb   : > { %2381 = vmatprep.subr.bf16.mxu0 %v3634_v17  ;;  %v2150_v15 = vsub.s32 0, %v2149_v14  ;;  %v2158_v16 = vsub.s32 2, %v2149_v14  ;;  %v2146_v17 = vld [vmem:[%s4408_s26] sm:$0xf]  ;;  %v2154_v3 = vsub.s32 1, %v2149_v14 }
 0xcbd   : > { %v2151_v19 = vrot.slane %v2146_v17, %v2150_v15  ;;  %v2155_v21 = vrot.slane %v2146_v17, %v2154_v3 }
 0xcbe   : > { %2382 = vmatpush1.bf16.msra.mxu0 %v3632_v18  ;;  %v2162_v18 = vsub.s32 3, %v2149_v14 }
 0xcbf   : > { %2383 = vmatprep.subr.bf16.mxu0 %v3640_v20  ;;  %v2159_v20 = vrot.slane %v2146_v17, %v2158_v16 }
 0xcc2   : > { %2384 = vmatpush1.bf16.msra.mxu0 %v3638_v22  ;;  %v2163_v22 = vrot.slane %v2146_v17, %v2162_v18 }
 0xcc3   : > { %2385 = vmatprep.subr.bf16.mxu0 %v3646_v24 }
 0xcc6   : > { %2386 = vmatpush1.bf16.msra.mxu0 %v3644_v26 }
 0xcc7   : > { %3287 = vmatprep.subr.bf16.mxu0 %v3648_v6 }
 0xd7c   : > { %v2064_v56 = vpop.f32.mrb[28].mxu0 }
 0xd7d   : > { %v2065_v43 = vadd.f32 %v3126_v51, %v2064_v56  ;;  %v3443_v44 = vpop.f32.mrb[29].mxu0  ;;  %v3137_v56 = vld [vmem:[%s708_s8] ss:$0 sm:$0xff] }
 0xd7e   : > { %v2067_v45 = vpop.f32.mrb[30].mxu0 }
 0xd7f   : > { %v2068_v46 = vadd.f32 %v3126_v51, %v2067_v45  ;;  %v3444_v47 = vpop.f32.mrb[31].mxu0  ;;  %v2071_v49 = vadd.f32 %v3719_v48, %v2065_v43 }
 0xd80   : > { %v3650_v47 = vld [vmem:[%s4414_s22 + $0x80] sm:$0xff]  }
 0xd81   : > { %2075 = vadd.xlane.f32.xlu0 %v2071_v49  ;;  %v2072_v50 = vadd.f32 %v3720_v32, %v2068_v46  ;;  %v3649_v46 = vld [vmem:[%s4414_s22] sm:$0xff]   ;;  %v3652_v32 = vld [vmem:[%s4414_s22 + $0xc8] sm:$0xff]  }
 0xd83   : > { %2077 = vadd.xlane.f32.xlu1 %v2072_v50 }
 0xe0e   : > { %v2076_v58 = vpop.xlane.xlu0 %2075 }
 0xe0f   : > { %v2079_v60 = vmul.f32 0.0078125, %v2076_v58  ;;  %v3662_v58 = vld [vmem:[%s4414_s22 + $0x98] sm:$0xff]  }
 0xe10   : > { %v2078_v61 = vpop.xlane.xlu1 %2077 }
 0xe11   : > { %v4701_v62 = vsub.f32 %v2071_v49, %v2079_v60  ;;  %v2080_v63 = vmul.f32 0.0078125, %v2078_v61  ;;  %v3651_v49 = vld [vmem:[%s4414_s22 + $0x48] sm:$0xff]   ;;  %v3663_v60 = vld [vmem:[%s4414_s22 + $0x60] sm:$0xff]  }
 0xe12   : > { %v3664_v61 = vld [vmem:[%s4414_s22 + $0xe0] sm:$0xff]  }
 0xe13   : > { %v4703_v0 = vsub.f32 %v2072_v50, %v2080_v63  ;;  %v2083_v1 = vmul.f32 %v4701_v62, %v4701_v62  ;;  %v3653_v50 = vld [vmem:[%s4414_s22 + $0x8] sm:$0xff]   ;;  %v3666_v63 = vld [vmem:[%s4414_s22 + $0xa0] sm:$0xff]  }
 0xe15   : > { %2085 = vadd.xlane.f32.xlu0 %v2083_v1  ;;  %v2084_v59 = vmul.f32 %v4703_v0, %v4703_v0  ;;  %v3668_v1 = vld [vmem:[%s4414_s22 + $0xe8] sm:$0xff]  }
 0xe19   : > { %2087 = vadd.xlane.f32.xlu0 %v2084_v59  ;;  %v3669_v59 = vld [vmem:[%s4414_s22 + $0x28] sm:$0xff]  }
 0xea2   : > { %v2086_v28 = vpop.xlane.xlu0 %2085 }
 0xea3   : > { %v2089_v29 = vmul.f32 0.0078125, %v2086_v28 }
 0xea5   : > { %v2091_v30 = vadd.f32 1e-05, %v2089_v29 }
 0xea6   : > { %v2088_v31 = vpop.xlane.xlu0 %2087 }
 0xea7   : > { %3715 = vrsqrt.f32 %v2091_v30  ;;  %v2090_v33 = vmul.f32 0.0078125, %v2088_v31 }
 0xea9   : > { %v2092_v34 = vadd.f32 1e-05, %v2090_v33 }
 0xeab   : > { %3717 = vrsqrt.f32 %v2092_v34 }
 0xeb1   : > { %v3716_v35 = vpop.eup %3715 }
 0xeb2   : > { %v2095_v38 = vmul.f32 %v3716_v35, %v4701_v62  ;;  %v3665_v62 = vld [vmem:[%s4414_s22 + $0x20] sm:$0xff]  }
 0xeb4   : > { %v2103_v51 = vmul.f32 %v3136_v39, %v2095_v38 }
 0xeb5   : > { %v3718_v40 = vpop.eup %3717 }
 0xeb6   : > { %v2096_v42 = vmul.f32 %v3718_v40, %v4703_v0  ;;  %v4747_v44 = vadd.f32 %v3137_v56, %v2103_v51  ;;  %v3667_v0 = vld [vmem:[%s4414_s22 + $0x68] sm:$0xff]  }
 0xeb8   : > { %v2104_v43 = vmul.f32 %v3136_v39, %v2096_v42 }
 0xeba   : > { %v4749_v45 = vadd.f32 %v3137_v56, %v2104_v43 }
 0xebc   : > { %v2113_v48 = vpack.c.bf16 %v4749_v45, %v4747_v44 }
 0xebe   : > { %2361 = vmatmul.mubr.bf16.vlgmr.msra.gmra.mrb[44].mxu1 %v2113_v48  ;;  %2404 = vmatmul.mubr.bf16.vlgmr.msra.gmra.mrb[32].mxu0 %v2113_v48 }
 0xebf   : > { %3266 = vmatpush3.bf16.msra.mxu1 %v3649_v46  ;;  %3288 = vmatpush3.bf16.msra.mxu0 %v3650_v47 }
 0xec0   : > { %3267 = vmatprep.subr.bf16.mxu1 %v3651_v49  ;;  %3289 = vmatprep.subr.bf16.mxu0 %v3652_v32 }
 0xec3   : > { %3268 = vmatpush3.bf16.msra.mxu1 %v3653_v50  ;;  %3290 = vmatpush3.bf16.msra.mxu0 %v3654_v52 }
 0xec4   : > { %3269 = vmatprep.subr.bf16.mxu1 %v3655_v53  ;;  %3291 = vmatprep.subr.bf16.mxu0 %v3656_v37 }
 0xec7   : > { %3270 = vmatpush3.bf16.msra.mxu1 %v3657_v54  ;;  %3292 = vmatpush3.bf16.msra.mxu0 %v3658_v36  ;;  %v3170_v36 = vld [vmem:[%s715_s19] ss:$0 sm:$0xff] }
 0xec8   : > { %3271 = vmatprep.subr.bf16.mxu1 %v3659_v55  ;;  %3293 = vmatprep.subr.bf16.mxu0 %v3660_v41 }
 0xecb   : > { %3272 = vmatpush3.bf16.msra.mxu1 %v3661_v57  ;;  %3294 = vmatpush3.bf16.msra.mxu0 %v3662_v58 }
 0xecc   : > { %3273 = vmatprep.subr.bf16.mxu1 %v3663_v60  ;;  %3295 = vmatprep.subr.bf16.mxu0 %v3664_v61 }
 0xecf   : > { %3274 = vmatpush3.bf16.msra.mxu1 %v3665_v62  ;;  %3296 = vmatpush3.bf16.msra.mxu0 %v3666_v63 }
 0xed0   : > { %3275 = vmatprep.subr.bf16.mxu1 %v3667_v0  ;;  %3297 = vmatprep.subr.bf16.mxu0 %v3668_v1 }
 0xed3   : > { %3276 = vmatpush3.bf16.msra.mxu1 %v3669_v59  ;;  %3298 = vmatpush3.bf16.msra.mxu0 %v3670_v7 }
 0xed4   : > { %3277 = vmatprep.subr.bf16.mxu1 %v3671_v2  ;;  %3299 = vmatprep.subr.bf16.mxu0 %v3672_v4 }
 0xed7   : > { %3278 = vmatpush3.bf16.msra.mxu1 %v3673_v8  ;;  %3300 = vmatpush3.bf16.msra.mxu0 %v3674_v5 }
 0xed8   : > { %3279 = vmatprep.subr.bf16.mxu1 %v3675_v9  ;;  %3301 = vmatprep.subr.bf16.mxu0 %v3676_v10 }
 0xedb   : > { %3280 = vmatpush3.bf16.msra.mxu1 %v3677_v11  ;;  %3302 = vmatpush3.bf16.msra.mxu0 %v3678_v12 }
 0xf91   : > { %v2362_v23 = vpop.f32.mrb[44].mxu1  ;;  %v2405_v24 = vpop.f32.mrb[32].mxu0 }
 0xf92   : > { %v2363_v25 = vadd.f32 %v2362_v23, %v2151_v19  ;;  %v2406_v26 = vadd.f32 %v2405_v24, %v2159_v20  ;;  %v2364_v27 = vpop.f32.mrb[45].mxu1  ;;  %v2407_v6 = vpop.f32.mrb[33].mxu0 }
 0xf93   : > { %v2365_v28 = vadd.f32 %v2364_v27, %v2155_v21  ;;  %v2408_v29 = vadd.f32 %v2407_v6, %v2163_v22  ;;  %v2366_v30 = vpop.f32.mrb[46].mxu1  ;;  %v2409_v31 = vpop.f32.mrb[34].mxu0 }
 0xf94   : > { %v2367_v33 = vadd.f32 %v2366_v30, %v2151_v19  ;;  %v2410_v34 = vadd.f32 %v2409_v31, %v2159_v20  ;;  %v2368_v35 = vpop.f32.mrb[47].mxu1  ;;  %v2411_v38 = vpop.f32.mrb[35].mxu0  ;;  %v2414_v42 = vmax.f32 %v2363_v25, 0.0  ;;  %v2416_v51 = vmax.f32 %v2406_v26, 0.0 }
 0xf95   : > { %v2369_v39 = vadd.f32 %v2368_v35, %v2155_v21  ;;  %v2412_v40 = vadd.f32 %v2411_v38, %v2163_v22  ;;  %v2415_v46 = vmax.f32 %v2365_v28, 0.0  ;;  %v2417_v47 = vmax.f32 %v2408_v29, 0.0 }
 0xf96   : > { %v2418_v56 = vmax.f32 %v2367_v33, 0.0  ;;  %v2420_v43 = vmax.f32 %v2410_v34, 0.0 }
 0xf97   : > { %v2419_v48 = vmax.f32 %v2369_v39, 0.0  ;;  %v2421_v49 = vmax.f32 %v2412_v40, 0.0 }
 0xf98   : > { %v2422_v32 = vpack.c.bf16 %v2418_v56, %v2414_v42  ;;  %v2424_v50 = vpack.c.bf16 %v2420_v43, %v2416_v51 }
 0xf99   : > { %v2423_v52 = vpack.c.bf16 %v2419_v48, %v2415_v46  ;;  %v2425_v53 = vpack.c.bf16 %v2421_v49, %v2417_v47 }
 0xf9b   : > { %2721 = vmatprep.mubr.bf16.mxu1 %v2423_v52  ;;  %2762 = vmatprep.mubr.bf16.mxu0 %v2425_v53 }
 0xf9c   : > { %2722 = vmatmul.mubr.bf16.vlgmr.msra.gmra.mrb[48].mxu1 %v2422_v32  ;;  %2763 = vmatmul.mubr.bf16.vlgmr.msra.gmra.mrb[36].mxu0 %v2424_v50 }
0x106f   : > { %v3281_v37 = vpop.f32.mrb[48].mxu1  ;;  %v3303_v54 = vpop.f32.mrb[36].mxu0 }
0x1070   : > { %v3282_v55 = vpop.f32.mrb[49].mxu1  ;;  %v3304_v41 = vpop.f32.mrb[37].mxu0 }
0x1071   : > { %v3283_v57 = vadd.f32 %v3282_v55, %v3281_v37  ;;  %v3305_v58 = vadd.f32 %v3304_v41, %v3303_v54  ;;  %v3284_v60 = vpop.f32.mrb[50].mxu1  ;;  %v3306_v61 = vpop.f32.mrb[38].mxu0 }
0x1072   : > { %v3285_v62 = vpop.f32.mrb[51].mxu1  ;;  %v3307_v63 = vpop.f32.mrb[39].mxu0 }
0x1073   : > { %v2724_v0 = vadd.f32 %v3283_v57, %v3170_v36  ;;  %v3286_v1 = vadd.f32 %v3285_v62, %v3284_v60  ;;  %v3308_v59 = vadd.f32 %v3307_v63, %v3306_v61 }
0x1075   : > { %v2765_v7 = vadd.f32 %v3305_v58, %v2724_v0  ;;  %v2727_v2 = vadd.f32 %v3286_v1, %v3170_v36  ;;  %2778 = sbr.rel (%p3203_p2) target bundleno = 4220 (0x107c), region = 96 }
0x1077   : > { %v2771_v4 = vadd.f32 %v2765_v7, %v4747_v44  ;;  %v2768_v8 = vadd.f32 %v3308_v59, %v2727_v2 }
0x1079   : > { %2773 = vst [vmem:[#allocation2] sm:$0xff] %v2771_v4  ;;  %v2772_v5 = vadd.f32 %v2768_v8, %v4749_v45  ;;  %2779 = vst [vmem:[#allocation12] sm:$0xff] (!%p3203_p2), %v2771_v4 }
0x107b   : > { %2774 = vst [vmem:[#allocation2 + $0x8] sm:$0xff] %v2772_v5  ;;  %2780 = vst [vmem:[#allocation12 + $0x8] sm:$0xff] (!%p3203_p2), %v2772_v5 }
0x107c PF: > { %s4010_s19 = smov [#allocation12]   ;;  %p4965_p8 = scmp.eq.s32.totalorder %s4231_s13, 1 }
0x107d   : > { %s2795_s21 = sshll.u32 %s4010_s19, 4  ;;  %s2796_s21 = int_to_ptr.vmem [resolvable:$true] %s2795_s21 }
0x107e   : > { %s3869_s27 = scalar_lea.vmem %s2796_s21, 256  ;;  %p3876_p1 = scmp.lt.s32.totalorder %s2796_s21, %s2796_s21 }
0x107f   : > { %p3870_p4 = scmp.ne.s32.totalorder %s2796_s21, %s3869_s27  ;;  %p3877_p11 = scmp.lt.s32.totalorder %s3869_s27, %s3869_s27 }
0x1081   : > { %p3871_p9 = pnand %p3870_p4, %p4965_p8  ;;  %p3878_p6 = por %p3877_p11, %p3876_p1 }
0x1083   : > { %p3872_p13 = pneg %p3871_p9 }
0x1085   : > { %p3879_p5 = pnand %p3878_p6, %p3872_p13 }
0x1087   : > { %3882 = shalt.err (!%p3879_p5)
}
0x1088   : > { %s4966_s0 = sld [smem:[#allocation39_spill]]  ;;  %p4967_p12 = pmov %p4965_p8 }
0x108e   : > { %s3883_s4 = scalar_lea.hbm %s4966_s0, 256 }
0x108f   : > { %p3884_p0 = scmp.ne.s32.totalorder %s4966_s0, %s3883_s4  ;;  %p3889_p3 = scmp.lt.u32.totalorder %s3883_s4, %s4966_s0 }
0x1091   : > { %p3885_p7 = pnand %p3884_p0, %p4967_p12 }
0x1093   : > { %p3886_p10 = pneg %p3885_p7 }
0x1095   : > { %p3891_p2 = pnand %p3889_p3, %p3886_p10 }
0x1097   : > { %3894 = shalt.err (!%p3891_p2)
}
0x1098   : > { %s4011_s18 = smov 128   ;;  %s4968_s11 = sld [smem:[#allocation29_spill]] }
0x1099   : > { %s4969_s20 = sld [smem:[#allocation27_spill]]  ;;  %s4012_s24 = smov 8  }
0x109a   : > { %p4970_p4 = pmov %p4965_p8  ;;  %s3214_s30 = sshll.u32 %s3981_s28, 10 }
0x109b   : > { %s4971_s12 = sld [smem:[#allocation40_spill]]  ;;  %s2813_s26 = sshll.u32 %s4416_s25, 4  ;;  %s4820_s26 = int_to_ptr.vmem [resolvable:$true] %s2813_s26 }
0x109c   : > { %3461 = dma.vmem_to_hbm [thread:$0]  (%p4970_p4), %s2796_s21, 256, %s4966_s0, [#allocation5], %s4011_s18, %s4011_s18, %s4012_s24  }
0x109d   : > { %s3895_s8 = scalar_lea.vmem %s4820_s26, 1024  ;;  %s4013_s19 = smov [#allocation13]  }
0x109e   : > { %s2782_s23 = scalar_lea.sflag [#allocation14], %s4968_s11  ;;  %p3896_p8 = scmp.ne.s32.totalorder %s4820_s26, %s3895_s8 }
0x109f   : > { %p4972_p9 = scmp.ne.s32.totalorder %s4969_s20, 0  ;;  %s3899_s21 = sshll.u32 %s4013_s19, 4  ;;  %s3900_s21 = int_to_ptr.vmem [resolvable:$false] %s3899_s21 }
0x10a0   : > { %s3901_s28 = scalar_lea.vmem %s3900_s21, 2048  ;;  %p3902_p11 = scmp.lt.s32.totalorder %s4820_s26, %s3900_s21 }
0x10a1   : > { %s4817_s15 = scalar_lea.hbm %s4971_s12, %s3214_s30  ;;  %p3897_p13 = pnand %p3896_p8, %p4972_p9 }
0x10a2   : > { %p3903_p6 = scmp.lt.s32.totalorder %s3901_s28, %s3895_s8 }
0x10a3   : > { %p3898_p1 = pneg %p3897_p13 }
0x10a4   : > { %p3904_p5 = por %p3903_p6, %p3902_p11 }
0x10a6   : > { %p3905_p0 = pnand %p3904_p5, %p3898_p1 }
0x10a8   : > { %3908 = shalt.err (!%p3905_p0)
}
0x10a9   : > { %s3909_s25 = scalar_lea.hbm %s4817_s15, 1024  ;;  %s3913_s22 = scalar_lea.hbm %s4971_s12, 2048 }
0x10aa   : > { %p3910_p12 = scmp.ne.s32.totalorder %s4817_s15, %s3909_s25  ;;  %p3914_p3 = scmp.lt.u32.totalorder %s4817_s15, %s4971_s12 }
0x10ab   : > { %p3915_p2 = scmp.lt.u32.totalorder %s3913_s22, %s3909_s25  ;;  %p3917_p8 = scmp.lt.u32.totalorder %s3909_s25, %s4817_s15 }
0x10ac   : > { %p3911_p7 = pnand %p3910_p12, %p4972_p9 }
0x10ad   : > { %p3916_p4 = por %p3915_p2, %p3914_p3 }
0x10ae   : > { %p3912_p10 = pneg %p3911_p7 }
0x10af   : > { %p3918_p13 = por %p3917_p8, %p3916_p4 }
0x10b1   : > { %p3919_p1 = pnand %p3918_p13, %p3912_p10 }
0x10b3   : > { %3922 = shalt.err (!%p3919_p1)
}
0x10b4   : > { %3462 = dma.vmem_to_hbm [thread:$0]  (%p4972_p9), %s4820_s26, 1024, %s4817_s15, %s2782_s23, %s4011_s18, %s4011_s18, %s4012_s24  }
0x10b5   : > { %p4973_p11 = scmp.eq.s32.totalorder %s4231_s13, 1 }
0x10b7   : > { %3960 = dma.done.wait (%p4973_p11), [#allocation5], 256   ;;  %p4974_p6 = pmov %p4973_p11 }
0x10b9   : > { %3962 = vsyncadd (%p4974_p6), [#allocation5], 4294967040 }
0x10ba PF: > { %s4975_s29 = sld [smem:[#allocation20_spill]]  ;;  %s4976_s7 = sld [smem:[#allocation28_spill]] }
0x10bb   : > { %s4977_s3 = sld [smem:[#allocation24_spill]] }
0x10c0   : > { %s2832_s17 = sand.u32 1, %s4975_s29   ;;  %p4978_p5 = scmp.ne.s32.totalorder %s4976_s7, 0 }
0x10c1   : > { %p4979_p0 = scmp.ge.s32.totalorder %s4977_s3, 2  ;;  %s2833_s20 = scalar_lea.sflag [#allocation14], %s2832_s17 }
0x10c3   : > { %p3484_p12 = pnand %p4979_p0, %p4978_p5 }
0x10c5   : > { %3964 = dma.done.wait (!%p3484_p12), %s2833_s20, 1024  }
0x10c6   : > { %3966 = vsyncadd (!%p3484_p12), %s2833_s20, 4294966272  ;;  %s35_s30 = sadd.s32 1, %s4977_s3   ;;  %s4980_s25 = sld [smem:[#allocation21_spill]] }
0x10c7   : > { %p32_p7 = scmp.ge.s32.totalorder %s35_s30, 4   ;;  %s4981_s26 = sld [smem:[#allocation22_spill]] }
0x10c8   : > { %s4982_s27 = sld [smem:[#allocation26_spill]]  ;;  %s4983_s28 = sld [smem:[#allocation23_spill]] }
0x10c9   : > { %s4984_s29 = sld [smem:[#allocation25_spill]]  ;;  %34 = sbr.rel (!%p32_p7) target bundleno = 22 (0x16), region = 196 }
0x10d0   :  { %2838 = vsyncpa [#allocation4], 1 }
0x10d1   :  { %2840 = vsyncpa [#allocation4 + $0x1], 1 }
0x10d2   :  { %2841 = vsyncpa [#allocation7], 1 }
0x10d3   :  { %2843 = vsyncpa [#allocation7 + $0x1], 1 }
0x10d4   :  { %2844 = vsyncpa [#allocation10], 1 }
0x10d5   :  { %2846 = vsyncpa [#allocation10 + $0x1], 1 }
0x10d6   :  { %2847 = vsyncpa [#allocation5], 1 }
0x10d7   :  { %2849 = vsyncpa [#allocation5 + $0x1], 1 }
0x10d8   :  { %2850 = vsyncpa [#allocation14], 1 }
0x10d9   :  { %2852 = vsyncpa [#allocation14 + $0x1], 1 }

</bundles_post_ra>
